<compile_context>
chip_gen: v7x
topology: tpu7x:2x2x1
jax: 0.10.0
libtpu: 0.0.40
codegen_flags: <defaults>
</compile_context>

<pallas_src>
import functools

import jax
import jax.numpy as jnp
from jax.experimental import pallas as pl
from jax.experimental.pallas import tpu as pltpu


def _round_up(n, m):
    return ((n + m - 1) // m) * m


# ----------------------------------------------------------------------------
# Pallas kernel: whole encode + autoregressive decode loop runs in VMEM.
# ----------------------------------------------------------------------------
def _seq2seq_kernel(src_ref,                       # (S*B, In)
                    e_wi_ref,                      # (In, 3*Hp)
                    e_wh_ref,                      # (H,  3*Hp)   K unpadded
                    d_wh_ref,                      # (H,  3*Hp)   K unpadded
                    w2i_ref,                       # (Fc, 3*Hp)   w2 @ d_wi
                    w1_ref,                        # (H,  Fc)     unpadded
                    w2_ref,                        # (Fc, 1)
                    bias_ref,                      # (8,  3*Hp)   packed rows
                    out_ref,                       # (horizon*B, 1)
                    y_buf,                         # scratch (horizon*B, Fc)
                    *, batch, seq_len, horizon):
    hidden = e_wh_ref.shape[0]                     # true hidden size (K)
    hp = e_wh_ref.shape[1] // 3                    # lane-padded gate width
    fc = w1_ref.shape[1]                           # FC width (unpadded)

    # packed bias rows:
    #   0: e_bx = [bi_r+bh_r, bi_z+bh_z, bi_n]   1: e_bh_n
    #   2: d_bx                                   3: d_bh_n
    #   4: d_wi (seed step)                       5: b2i = b2*d_wi + d_bx
    #   6: b1                                     7: b2 (scalar at [7,0])

    def gru_step(gi, gh, h, bhn):
        # gi already includes (bi_r+bh_r, bi_z+bh_z, bi_n); bhn is bh_n only
        # (it must stay inside r*(...), PyTorch GRU semantics).
        r = jax.nn.sigmoid(gi[:, 0 * hp:1 * hp] + gh[:, 0 * hp:1 * hp])
        z = jax.nn.sigmoid(gi[:, 1 * hp:2 * hp] + gh[:, 1 * hp:2 * hp])
        n = jnp.tanh(gi[:, 2 * hp:3 * hp] + r * (gh[:, 2 * hp:3 * hp] + bhn))
        return (1.0 - z) * n + z * h

    # ---- encoder: input projection hoisted off the recurrence --------------
    src_flat = src_ref[...]                                    # (S*B, In)
    e_gi_all = (jnp.dot(src_flat, e_wi_ref[...],
                        preferred_element_type=jnp.float32)
                + bias_ref[0:1, :])                            # (S*B, 3*Hp)

    h = jnp.zeros((batch, hp), jnp.float32)                    # padded lanes = 0
    for t in range(seq_len):                                   # fully unrolled
        gh = jnp.dot(h[:, :hidden], e_wh_ref[...],
                     preferred_element_type=jnp.float32)
        h = gru_step(e_gi_all[t * batch:(t + 1) * batch, :], gh, h,
                     bias_ref[1:2, :hp])

    # ---- decoder: autoregressive decode -------------------------------------
    seed = src_flat[(seq_len - 1) * batch:, 0:1]               # (B, 1)
    # seed step input projection: width-1 -> VPU broadcast multiply
    gi = seed * bias_ref[4:5, :] + bias_ref[2:3, :]            # (B, 3*Hp)

    for t in range(horizon):                                   # fully unrolled
        gh = jnp.dot(h[:, :hidden], d_wh_ref[...],
                     preferred_element_type=jnp.float32)
        h = gru_step(gi, gh, h, bias_ref[3:4, :hp])
        y = jnp.maximum(
            jnp.dot(h[:, :hidden], w1_ref[...],
                    preferred_element_type=jnp.float32)
            + bias_ref[6:7, :fc], 0.0)                         # (B, Fc)
        y_buf[t * batch:(t + 1) * batch, :] = y
        if t + 1 < horizon:
            # w2 folded in: gi = (y@w2+b2)@d_wi + d_bx == y@W2i + b2i
            gi = (jnp.dot(y, w2i_ref[...],
                          preferred_element_type=jnp.float32)
                  + bias_ref[5:6, :])

    # outputs computed off the recurrence with one wide matmul
    preds = (jnp.dot(y_buf[...], w2_ref[...],
                     preferred_element_type=jnp.float32)
             + bias_ref[7:8, 0:1])                             # (horizon*B, 1)
    out_ref[...] = preds


# ----------------------------------------------------------------------------
# One-time parameter preparation (call ONCE, outside the per-call jit).
# ----------------------------------------------------------------------------
def prepare_params(p, lane=128):
    hidden = p["e_wh"].shape[1]
    hp = _round_up(hidden, lane)
    width = 3 * hp

    def pad_cols(w, cols):
        return jnp.pad(w, ((0, 0), (0, cols - w.shape[1])))

    def gates_cat(w3):
        # (3, rows, H) -> (rows, 3*Hp), gate order (r, z, n); only the gate
        # (output) axis is padded -- contraction rows stay unpadded.
        return jnp.concatenate([pad_cols(w3[g], hp) for g in range(3)], axis=1)

    e_bx = gates_cat(jnp.stack([p["e_bi"][0] + p["e_bh"][0],
                                p["e_bi"][1] + p["e_bh"][1],
                                p["e_bi"][2]], axis=0))        # (1, 3*Hp)
    d_bx = gates_cat(jnp.stack([p["d_bi"][0] + p["d_bh"][0],
                                p["d_bi"][1] + p["d_bh"][1],
                                p["d_bi"][2]], axis=0))        # (1, 3*Hp)
    d_wi = gates_cat(p["d_wi"])                                # (1, 3*Hp)

    w2i = p["w2"] @ d_wi                                       # (Fc, 3*Hp)
    b2i = p["b2"] * d_wi + d_bx                                # (1, 3*Hp)

    rows = [e_bx, p["e_bh"][2], d_bx, p["d_bh"][2],
            d_wi, b2i, p["b1"], p["b2"]]
    biases = jnp.concatenate([pad_cols(r, width) for r in rows], axis=0)

    return {
        "e_wi": gates_cat(p["e_wi"]),                          # (In, 3*Hp)
        "e_wh": gates_cat(p["e_wh"]),                          # (H,  3*Hp)
        "d_wh": gates_cat(p["d_wh"]),                          # (H,  3*Hp)
        "w2i": w2i,                                            # (Fc, 3*Hp)
        "w1": p["w1"],                                         # (H,  Fc)
        "w2": p["w2"],                                         # (Fc, 1)
        "biases": biases,                                      # (8,  3*Hp)
    }


@functools.partial(jax.jit, static_argnames=("horizon",))
def seq2seq_forward(src, prep, horizon):
    """src: (seq_len, batch, input_size) f32, prep: prepare_params() output.

    Returns (horizon, batch, 1) f32.
    """
    seq_len, batch, input_size = src.shape
    fc = prep["w1"].shape[1]
    src_flat = src.reshape(seq_len * batch, input_size)        # free bitcast

    kernel = functools.partial(_seq2seq_kernel, batch=batch,
                               seq_len=seq_len, horizon=horizon)
    vmem = pl.BlockSpec(memory_space=pltpu.MemorySpace.VMEM)

    # Total footprint is ~100 KB -> everything lives in VMEM, no grid needed.
    out = pl.pallas_call(
        kernel,
        out_shape=jax.ShapeDtypeStruct((horizon * batch, 1), jnp.float32),
        in_specs=[vmem] * 8,
        out_specs=vmem,
        scratch_shapes=[pltpu.VMEM((horizon * batch, fc), jnp.float32)],
    )(src_flat, prep["e_wi"], prep["e_wh"], prep["d_wh"],
      prep["w2i"], prep["w1"], prep["w2"], prep["biases"])

    return out.reshape(horizon, batch, 1)                      # free bitcast


# ----------------------------------------------------------------------------
# Deterministic parameter init (PyTorch-style U(-1/sqrt(H), 1/sqrt(H)))
# ----------------------------------------------------------------------------
def init_params(key, input_size, hidden_size, hidden_fc, output_size):
    bound = 1.0 / jnp.sqrt(hidden_size)
    bound_fc = 1.0 / jnp.sqrt(hidden_fc)
    keys = jax.random.split(key, 12)

    def u(k, shape, b):
        return jax.random.uniform(k, shape, jnp.float32, -b, b)

    return {
        # encoder GRU (input_size -> hidden); gate order (r, z, n)
        "e_wi": u(keys[0], (3, input_size, hidden_size), bound),
        "e_wh": u(keys[1], (3, hidden_size, hidden_size), bound),
        "e_bi": u(keys[2], (3, 1, hidden_size), bound),
        "e_bh": u(keys[3], (3, 1, hidden_size), bound),
        # decoder GRU (output_size -> hidden)
        "d_wi": u(keys[4], (3, output_size, hidden_size), bound),
        "d_wh": u(keys[5], (3, hidden_size, hidden_size), bound),
        "d_bi": u(keys[6], (3, 1, hidden_size), bound),
        "d_bh": u(keys[7], (3, 1, hidden_size), bound),
        # decoder FC head
        "w1": u(keys[8], (hidden_size, hidden_fc), bound),
        "b1": u(keys[9], (1, hidden_fc), bound),
        "w2": u(keys[10], (hidden_fc, output_size), bound_fc),
        "b2": u(keys[11], (1, output_size), bound_fc),
    }


# ----------------------------------------------------------------------------
# Pure-JAX reference (unfused, unpadded math) for a correctness check
# ----------------------------------------------------------------------------
def seq2seq_reference(src, p, horizon):
    def gru(x, h, wi, wh, bi, bh):
        r = jax.nn.sigmoid(x @ wi[0] + bi[0] + h @ wh[0] + bh[0])
        z = jax.nn.sigmoid(x @ wi[1] + bi[1] + h @ wh[1] + bh[1])
        n = jnp.tanh(x @ wi[2] + bi[2] + r * (h @ wh[2] + bh[2]))
        return (1.0 - z) * n + z * h

    seq_len, batch, _ = src.shape
    h = jnp.zeros((batch, p["e_wh"].shape[1]), jnp.float32)
    for t in range(seq_len):
        h = gru(src[t], h, p["e_wi"], p["e_wh"], p["e_bi"], p["e_bh"])
    dec_in = src[-1, :, 0:1]
    outs = []
    for _ in range(horizon):
        h = gru(dec_in, h, p["d_wi"], p["d_wh"], p["d_bi"], p["d_bh"])
        y = jnp.maximum(h @ p["w1"] + p["b1"], 0.0)
        dec_in = y @ p["w2"] + p["b2"]
        outs.append(dec_in)
    return jnp.stack(outs, axis=0)


if __name__ == "__main__":
    # Small shapes consistent with the module: input_size=3, output_size=1.
    seq_len, batch = 8, 2
    input_size, hidden_size, hidden_fc, output_size = 3, 32, 32, 1
    horizon = 5

    key = jax.random.PRNGKey(0)
    k_src, k_par = jax.random.split(key)
    src = jax.random.normal(k_src, (seq_len, batch, input_size), jnp.float32)
    params = init_params(k_par, input_size, hidden_size, hidden_fc, output_size)

    # Hoisted out of the per-call path: build fused/padded weights ONCE.
    prep = prepare_params(params)

    out = seq2seq_forward(src, prep, horizon)
    out = jax.block_until_ready(out)

    ref = seq2seq_reference(src, params, horizon)
    assert out.shape == (horizon, batch, 1)
    err = float(jnp.max(jnp.abs(out - ref)))
    assert err < 1e-3, f"mismatch vs pure-JAX reference: {err}"

    print("KERNEL_OK")
</pallas_src>

<mosaic_0001>
module attributes {stable_mosaic.version = 11 : i64} {
  func.func @_seq2seq_kernel(%arg0: memref<16x3xf32, #tpu.memory_space<vmem>>, %arg1: memref<3x384xf32, #tpu.memory_space<vmem>>, %arg2: memref<32x384xf32, #tpu.memory_space<vmem>>, %arg3: memref<32x384xf32, #tpu.memory_space<vmem>>, %arg4: memref<32x384xf32, #tpu.memory_space<vmem>>, %arg5: memref<32x32xf32, #tpu.memory_space<vmem>>, %arg6: memref<32x1xf32, #tpu.memory_space<vmem>>, %arg7: memref<8x384xf32, #tpu.memory_space<vmem>>, %arg8: memref<10x1xf32, #tpu.memory_space<vmem>>, %arg9: memref<10x32xf32, #tpu.memory_space<vmem>>) attributes {dimension_semantics = [], scalar_prefetch = 0 : i64, scratch_operands = 1 : i64, tpu.core_type = #tpu.core_type<tc>} {
    %c0 = arith.constant 0 : index
    %c0_0 = arith.constant 0 : index
    %0 = vector.load %arg0[%c0, %c0_0] : memref<16x3xf32, #tpu.memory_space<vmem>>, vector<16x3xf32>
    %c0_1 = arith.constant 0 : index
    %c0_2 = arith.constant 0 : index
    %1 = vector.load %arg1[%c0_1, %c0_2] : memref<3x384xf32, #tpu.memory_space<vmem>>, vector<3x384xf32>
    %cst = arith.constant dense<0.000000e+00> : vector<16x384xf32>
    %2 = tpu.matmul %0, %1, %cst {dimension_numbers = #tpu.dot_dimension_numbers<[1], [0], [0], [1], [0, 0, 1, 1], [], []>} : vector<16x3xf32>, vector<3x384xf32>, vector<16x384xf32> -> vector<16x384xf32>
    %c0_3 = arith.constant 0 : index
    %c0_4 = arith.constant 0 : index
    %3 = vector.load %arg7[%c0_3, %c0_4] : memref<8x384xf32, #tpu.memory_space<vmem>>, vector<1x384xf32>
    %4 = vector.broadcast %3 : vector<1x384xf32> to vector<16x384xf32>
    %5 = arith.addf %2, %4 : vector<16x384xf32>
    %cst_5 = arith.constant 0.000000e+00 : f32
    %6 = vector.broadcast %cst_5 : f32 to vector<2x128xf32>
    %7 = vector.extract_strided_slice %6 {offsets = [0, 0], sizes = [2, 32], strides = [1, 1]} : vector<2x128xf32> to vector<2x32xf32>
    %c0_6 = arith.constant 0 : index
    %c0_7 = arith.constant 0 : index
    %8 = vector.load %arg2[%c0_6, %c0_7] : memref<32x384xf32, #tpu.memory_space<vmem>>, vector<32x384xf32>
    %cst_8 = arith.constant dense<0.000000e+00> : vector<2x384xf32>
    %9 = tpu.matmul %7, %8, %cst_8 {dimension_numbers = #tpu.dot_dimension_numbers<[1], [0], [0], [1], [0, 0, 1, 1], [], []>} : vector<2x32xf32>, vector<32x384xf32>, vector<2x384xf32> -> vector<2x384xf32>
    %10 = vector.extract_strided_slice %5 {offsets = [0, 0], sizes = [2, 384], strides = [1, 1]} : vector<16x384xf32> to vector<2x384xf32>
    %c1 = arith.constant 1 : index
    %c0_9 = arith.constant 0 : index
    %11 = vector.load %arg7[%c1, %c0_9] : memref<8x384xf32, #tpu.memory_space<vmem>>, vector<1x128xf32>
    %12 = vector.extract_strided_slice %10 {offsets = [0, 0], sizes = [2, 128], strides = [1, 1]} : vector<2x384xf32> to vector<2x128xf32>
    %13 = vector.extract_strided_slice %9 {offsets = [0, 0], sizes = [2, 128], strides = [1, 1]} : vector<2x384xf32> to vector<2x128xf32>
    %14 = arith.addf %12, %13 : vector<2x128xf32>
    %15 = arith.negf %14 : vector<2x128xf32>
    %16 = math.exp %15 : vector<2x128xf32>
    %cst_10 = arith.constant 1.000000e+00 : f32
    %17 = vector.broadcast %cst_10 : f32 to vector<2x128xf32>
    %18 = arith.addf %17, %16 : vector<2x128xf32>
    %19 = arith.divf %17, %18 : vector<2x128xf32>
    %20 = vector.extract_strided_slice %10 {offsets = [0, 128], sizes = [2, 128], strides = [1, 1]} : vector<2x384xf32> to vector<2x128xf32>
    %21 = vector.extract_strided_slice %9 {offsets = [0, 128], sizes = [2, 128], strides = [1, 1]} : vector<2x384xf32> to vector<2x128xf32>
    %22 = arith.addf %20, %21 : vector<2x128xf32>
    %23 = arith.negf %22 : vector<2x128xf32>
    %24 = math.exp %23 : vector<2x128xf32>
    %cst_11 = arith.constant 1.000000e+00 : f32
    %25 = vector.broadcast %cst_11 : f32 to vector<2x128xf32>
    %26 = arith.addf %25, %24 : vector<2x128xf32>
    %27 = arith.divf %25, %26 : vector<2x128xf32>
    %28 = vector.extract_strided_slice %10 {offsets = [0, 256], sizes = [2, 128], strides = [1, 1]} : vector<2x384xf32> to vector<2x128xf32>
    %29 = vector.extract_strided_slice %9 {offsets = [0, 256], sizes = [2, 128], strides = [1, 1]} : vector<2x384xf32> to vector<2x128xf32>
    %30 = vector.broadcast %11 : vector<1x128xf32> to vector<2x128xf32>
    %31 = arith.addf %29, %30 : vector<2x128xf32>
    %32 = arith.mulf %19, %31 : vector<2x128xf32>
    %33 = arith.addf %28, %32 : vector<2x128xf32>
    %34 = math.tanh %33 : vector<2x128xf32>
    %cst_12 = arith.constant 1.000000e+00 : f32
    %35 = vector.broadcast %cst_12 : f32 to vector<2x128xf32>
    %36 = arith.subf %35, %27 : vector<2x128xf32>
    %37 = arith.mulf %36, %34 : vector<2x128xf32>
    %38 = arith.mulf %27, %6 : vector<2x128xf32>
    %39 = arith.addf %37, %38 : vector<2x128xf32>
    %40 = vector.extract_strided_slice %39 {offsets = [0, 0], sizes = [2, 32], strides = [1, 1]} : vector<2x128xf32> to vector<2x32xf32>
    %c0_13 = arith.constant 0 : index
    %c0_14 = arith.constant 0 : index
    %41 = vector.load %arg2[%c0_13, %c0_14] : memref<32x384xf32, #tpu.memory_space<vmem>>, vector<32x384xf32>
    %cst_15 = arith.constant dense<0.000000e+00> : vector<2x384xf32>
    %42 = tpu.matmul %40, %41, %cst_15 {dimension_numbers = #tpu.dot_dimension_numbers<[1], [0], [0], [1], [0, 0, 1, 1], [], []>} : vector<2x32xf32>, vector<32x384xf32>, vector<2x384xf32> -> vector<2x384xf32>
    %43 = vector.extract_strided_slice %5 {offsets = [2, 0], sizes = [2, 384], strides = [1, 1]} : vector<16x384xf32> to vector<2x384xf32>
    %c1_16 = arith.constant 1 : index
    %c0_17 = arith.constant 0 : index
    %44 = vector.load %arg7[%c1_16, %c0_17] : memref<8x384xf32, #tpu.memory_space<vmem>>, vector<1x128xf32>
    %45 = vector.extract_strided_slice %43 {offsets = [0, 0], sizes = [2, 128], strides = [1, 1]} : vector<2x384xf32> to vector<2x128xf32>
    %46 = vector.extract_strided_slice %42 {offsets = [0, 0], sizes = [2, 128], strides = [1, 1]} : vector<2x384xf32> to vector<2x128xf32>
    %47 = arith.addf %45, %46 : vector<2x128xf32>
    %48 = arith.negf %47 : vector<2x128xf32>
    %49 = math.exp %48 : vector<2x128xf32>
    %cst_18 = arith.constant 1.000000e+00 : f32
    %50 = vector.broadcast %cst_18 : f32 to vector<2x128xf32>
    %51 = arith.addf %50, %49 : vector<2x128xf32>
    %52 = arith.divf %50, %51 : vector<2x128xf32>
    %53 = vector.extract_strided_slice %43 {offsets = [0, 128], sizes = [2, 128], strides = [1, 1]} : vector<2x384xf32> to vector<2x128xf32>
    %54 = vector.extract_strided_slice %42 {offsets = [0, 128], sizes = [2, 128], strides = [1, 1]} : vector<2x384xf32> to vector<2x128xf32>
    %55 = arith.addf %53, %54 : vector<2x128xf32>
    %56 = arith.negf %55 : vector<2x128xf32>
    %57 = math.exp %56 : vector<2x128xf32>
    %cst_19 = arith.constant 1.000000e+00 : f32
    %58 = vector.broadcast %cst_19 : f32 to vector<2x128xf32>
    %59 = arith.addf %58, %57 : vector<2x128xf32>
    %60 = arith.divf %58, %59 : vector<2x128xf32>
    %61 = vector.extract_strided_slice %43 {offsets = [0, 256], sizes = [2, 128], strides = [1, 1]} : vector<2x384xf32> to vector<2x128xf32>
    %62 = vector.extract_strided_slice %42 {offsets = [0, 256], sizes = [2, 128], strides = [1, 1]} : vector<2x384xf32> to vector<2x128xf32>
    %63 = vector.broadcast %44 : vector<1x128xf32> to vector<2x128xf32>
    %64 = arith.addf %62, %63 : vector<2x128xf32>
    %65 = arith.mulf %52, %64 : vector<2x128xf32>
    %66 = arith.addf %61, %65 : vector<2x128xf32>
    %67 = math.tanh %66 : vector<2x128xf32>
    %cst_20 = arith.constant 1.000000e+00 : f32
    %68 = vector.broadcast %cst_20 : f32 to vector<2x128xf32>
    %69 = arith.subf %68, %60 : vector<2x128xf32>
    %70 = arith.mulf %69, %67 : vector<2x128xf32>
    %71 = arith.mulf %60, %39 : vector<2x128xf32>
    %72 = arith.addf %70, %71 : vector<2x128xf32>
    %73 = vector.extract_strided_slice %72 {offsets = [0, 0], sizes = [2, 32], strides = [1, 1]} : vector<2x128xf32> to vector<2x32xf32>
    %c0_21 = arith.constant 0 : index
    %c0_22 = arith.constant 0 : index
    %74 = vector.load %arg2[%c0_21, %c0_22] : memref<32x384xf32, #tpu.memory_space<vmem>>, vector<32x384xf32>
    %cst_23 = arith.constant dense<0.000000e+00> : vector<2x384xf32>
    %75 = tpu.matmul %73, %74, %cst_23 {dimension_numbers = #tpu.dot_dimension_numbers<[1], [0], [0], [1], [0, 0, 1, 1], [], []>} : vector<2x32xf32>, vector<32x384xf32>, vector<2x384xf32> -> vector<2x384xf32>
    %76 = vector.extract_strided_slice %5 {offsets = [4, 0], sizes = [2, 384], strides = [1, 1]} : vector<16x384xf32> to vector<2x384xf32>
    %c1_24 = arith.constant 1 : index
    %c0_25 = arith.constant 0 : index
    %77 = vector.load %arg7[%c1_24, %c0_25] : memref<8x384xf32, #tpu.memory_space<vmem>>, vector<1x128xf32>
    %78 = vector.extract_strided_slice %76 {offsets = [0, 0], sizes = [2, 128], strides = [1, 1]} : vector<2x384xf32> to vector<2x128xf32>
    %79 = vector.extract_strided_slice %75 {offsets = [0, 0], sizes = [2, 128], strides = [1, 1]} : vector<2x384xf32> to vector<2x128xf32>
    %80 = arith.addf %78, %79 : vector<2x128xf32>
    %81 = arith.negf %80 : vector<2x128xf32>
    %82 = math.exp %81 : vector<2x128xf32>
    %cst_26 = arith.constant 1.000000e+00 : f32
    %83 = vector.broadcast %cst_26 : f32 to vector<2x128xf32>
    %84 = arith.addf %83, %82 : vector<2x128xf32>
    %85 = arith.divf %83, %84 : vector<2x128xf32>
    %86 = vector.extract_strided_slice %76 {offsets = [0, 128], sizes = [2, 128], strides = [1, 1]} : vector<2x384xf32> to vector<2x128xf32>
    %87 = vector.extract_strided_slice %75 {offsets = [0, 128], sizes = [2, 128], strides = [1, 1]} : vector<2x384xf32> to vector<2x128xf32>
    %88 = arith.addf %86, %87 : vector<2x128xf32>
    %89 = arith.negf %88 : vector<2x128xf32>
    %90 = math.exp %89 : vector<2x128xf32>
    %cst_27 = arith.constant 1.000000e+00 : f32
    %91 = vector.broadcast %cst_27 : f32 to vector<2x128xf32>
    %92 = arith.addf %91, %90 : vector<2x128xf32>
    %93 = arith.divf %91, %92 : vector<2x128xf32>
    %94 = vector.extract_strided_slice %76 {offsets = [0, 256], sizes = [2, 128], strides = [1, 1]} : vector<2x384xf32> to vector<2x128xf32>
    %95 = vector.extract_strided_slice %75 {offsets = [0, 256], sizes = [2, 128], strides = [1, 1]} : vector<2x384xf32> to vector<2x128xf32>
    %96 = vector.broadcast %77 : vector<1x128xf32> to vector<2x128xf32>
    %97 = arith.addf %95, %96 : vector<2x128xf32>
    %98 = arith.mulf %85, %97 : vector<2x128xf32>
    %99 = arith.addf %94, %98 : vector<2x128xf32>
    %100 = math.tanh %99 : vector<2x128xf32>
    %cst_28 = arith.constant 1.000000e+00 : f32
    %101 = vector.broadcast %cst_28 : f32 to vector<2x128xf32>
    %102 = arith.subf %101, %93 : vector<2x128xf32>
    %103 = arith.mulf %102, %100 : vector<2x128xf32>
    %104 = arith.mulf %93, %72 : vector<2x128xf32>
    %105 = arith.addf %103, %104 : vector<2x128xf32>
    %106 = vector.extract_strided_slice %105 {offsets = [0, 0], sizes = [2, 32], strides = [1, 1]} : vector<2x128xf32> to vector<2x32xf32>
    %c0_29 = arith.constant 0 : index
    %c0_30 = arith.constant 0 : index
    %107 = vector.load %arg2[%c0_29, %c0_30] : memref<32x384xf32, #tpu.memory_space<vmem>>, vector<32x384xf32>
    %cst_31 = arith.constant dense<0.000000e+00> : vector<2x384xf32>
    %108 = tpu.matmul %106, %107, %cst_31 {dimension_numbers = #tpu.dot_dimension_numbers<[1], [0], [0], [1], [0, 0, 1, 1], [], []>} : vector<2x32xf32>, vector<32x384xf32>, vector<2x384xf32> -> vector<2x384xf32>
    %109 = vector.extract_strided_slice %5 {offsets = [6, 0], sizes = [2, 384], strides = [1, 1]} : vector<16x384xf32> to vector<2x384xf32>
    %c1_32 = arith.constant 1 : index
    %c0_33 = arith.constant 0 : index
    %110 = vector.load %arg7[%c1_32, %c0_33] : memref<8x384xf32, #tpu.memory_space<vmem>>, vector<1x128xf32>
    %111 = vector.extract_strided_slice %109 {offsets = [0, 0], sizes = [2, 128], strides = [1, 1]} : vector<2x384xf32> to vector<2x128xf32>
    %112 = vector.extract_strided_slice %108 {offsets = [0, 0], sizes = [2, 128], strides = [1, 1]} : vector<2x384xf32> to vector<2x128xf32>
    %113 = arith.addf %111, %112 : vector<2x128xf32>
    %114 = arith.negf %113 : vector<2x128xf32>
    %115 = math.exp %114 : vector<2x128xf32>
    %cst_34 = arith.constant 1.000000e+00 : f32
    %116 = vector.broadcast %cst_34 : f32 to vector<2x128xf32>
    %117 = arith.addf %116, %115 : vector<2x128xf32>
    %118 = arith.divf %116, %117 : vector<2x128xf32>
    %119 = vector.extract_strided_slice %109 {offsets = [0, 128], sizes = [2, 128], strides = [1, 1]} : vector<2x384xf32> to vector<2x128xf32>
    %120 = vector.extract_strided_slice %108 {offsets = [0, 128], sizes = [2, 128], strides = [1, 1]} : vector<2x384xf32> to vector<2x128xf32>
    %121 = arith.addf %119, %120 : vector<2x128xf32>
    %122 = arith.negf %121 : vector<2x128xf32>
    %123 = math.exp %122 : vector<2x128xf32>
    %cst_35 = arith.constant 1.000000e+00 : f32
    %124 = vector.broadcast %cst_35 : f32 to vector<2x128xf32>
    %125 = arith.addf %124, %123 : vector<2x128xf32>
    %126 = arith.divf %124, %125 : vector<2x128xf32>
    %127 = vector.extract_strided_slice %109 {offsets = [0, 256], sizes = [2, 128], strides = [1, 1]} : vector<2x384xf32> to vector<2x128xf32>
    %128 = vector.extract_strided_slice %108 {offsets = [0, 256], sizes = [2, 128], strides = [1, 1]} : vector<2x384xf32> to vector<2x128xf32>
    %129 = vector.broadcast %110 : vector<1x128xf32> to vector<2x128xf32>
    %130 = arith.addf %128, %129 : vector<2x128xf32>
    %131 = arith.mulf %118, %130 : vector<2x128xf32>
    %132 = arith.addf %127, %131 : vector<2x128xf32>
    %133 = math.tanh %132 : vector<2x128xf32>
    %cst_36 = arith.constant 1.000000e+00 : f32
    %134 = vector.broadcast %cst_36 : f32 to vector<2x128xf32>
    %135 = arith.subf %134, %126 : vector<2x128xf32>
    %136 = arith.mulf %135, %133 : vector<2x128xf32>
    %137 = arith.mulf %126, %105 : vector<2x128xf32>
    %138 = arith.addf %136, %137 : vector<2x128xf32>
    %139 = vector.extract_strided_slice %138 {offsets = [0, 0], sizes = [2, 32], strides = [1, 1]} : vector<2x128xf32> to vector<2x32xf32>
    %c0_37 = arith.constant 0 : index
    %c0_38 = arith.constant 0 : index
    %140 = vector.load %arg2[%c0_37, %c0_38] : memref<32x384xf32, #tpu.memory_space<vmem>>, vector<32x384xf32>
    %cst_39 = arith.constant dense<0.000000e+00> : vector<2x384xf32>
    %141 = tpu.matmul %139, %140, %cst_39 {dimension_numbers = #tpu.dot_dimension_numbers<[1], [0], [0], [1], [0, 0, 1, 1], [], []>} : vector<2x32xf32>, vector<32x384xf32>, vector<2x384xf32> -> vector<2x384xf32>
    %142 = vector.extract_strided_slice %5 {offsets = [8, 0], sizes = [2, 384], strides = [1, 1]} : vector<16x384xf32> to vector<2x384xf32>
    %c1_40 = arith.constant 1 : index
    %c0_41 = arith.constant 0 : index
    %143 = vector.load %arg7[%c1_40, %c0_41] : memref<8x384xf32, #tpu.memory_space<vmem>>, vector<1x128xf32>
    %144 = vector.extract_strided_slice %142 {offsets = [0, 0], sizes = [2, 128], strides = [1, 1]} : vector<2x384xf32> to vector<2x128xf32>
    %145 = vector.extract_strided_slice %141 {offsets = [0, 0], sizes = [2, 128], strides = [1, 1]} : vector<2x384xf32> to vector<2x128xf32>
    %146 = arith.addf %144, %145 : vector<2x128xf32>
    %147 = arith.negf %146 : vector<2x128xf32>
    %148 = math.exp %147 : vector<2x128xf32>
    %cst_42 = arith.constant 1.000000e+00 : f32
    %149 = vector.broadcast %cst_42 : f32 to vector<2x128xf32>
    %150 = arith.addf %149, %148 : vector<2x128xf32>
    %151 = arith.divf %149, %150 : vector<2x128xf32>
    %152 = vector.extract_strided_slice %142 {offsets = [0, 128], sizes = [2, 128], strides = [1, 1]} : vector<2x384xf32> to vector<2x128xf32>
    %153 = vector.extract_strided_slice %141 {offsets = [0, 128], sizes = [2, 128], strides = [1, 1]} : vector<2x384xf32> to vector<2x128xf32>
    %154 = arith.addf %152, %153 : vector<2x128xf32>
    %155 = arith.negf %154 : vector<2x128xf32>
    %156 = math.exp %155 : vector<2x128xf32>
    %cst_43 = arith.constant 1.000000e+00 : f32
    %157 = vector.broadcast %cst_43 : f32 to vector<2x128xf32>
    %158 = arith.addf %157, %156 : vector<2x128xf32>
    %159 = arith.divf %157, %158 : vector<2x128xf32>
    %160 = vector.extract_strided_slice %142 {offsets = [0, 256], sizes = [2, 128], strides = [1, 1]} : vector<2x384xf32> to vector<2x128xf32>
    %161 = vector.extract_strided_slice %141 {offsets = [0, 256], sizes = [2, 128], strides = [1, 1]} : vector<2x384xf32> to vector<2x128xf32>
    %162 = vector.broadcast %143 : vector<1x128xf32> to vector<2x128xf32>
    %163 = arith.addf %161, %162 : vector<2x128xf32>
    %164 = arith.mulf %151, %163 : vector<2x128xf32>
    %165 = arith.addf %160, %164 : vector<2x128xf32>
    %166 = math.tanh %165 : vector<2x128xf32>
    %cst_44 = arith.constant 1.000000e+00 : f32
    %167 = vector.broadcast %cst_44 : f32 to vector<2x128xf32>
    %168 = arith.subf %167, %159 : vector<2x128xf32>
    %169 = arith.mulf %168, %166 : vector<2x128xf32>
    %170 = arith.mulf %159, %138 : vector<2x128xf32>
    %171 = arith.addf %169, %170 : vector<2x128xf32>
    %172 = vector.extract_strided_slice %171 {offsets = [0, 0], sizes = [2, 32], strides = [1, 1]} : vector<2x128xf32> to vector<2x32xf32>
    %c0_45 = arith.constant 0 : index
    %c0_46 = arith.constant 0 : index
    %173 = vector.load %arg2[%c0_45, %c0_46] : memref<32x384xf32, #tpu.memory_space<vmem>>, vector<32x384xf32>
    %cst_47 = arith.constant dense<0.000000e+00> : vector<2x384xf32>
    %174 = tpu.matmul %172, %173, %cst_47 {dimension_numbers = #tpu.dot_dimension_numbers<[1], [0], [0], [1], [0, 0, 1, 1], [], []>} : vector<2x32xf32>, vector<32x384xf32>, vector<2x384xf32> -> vector<2x384xf32>
    %175 = vector.extract_strided_slice %5 {offsets = [10, 0], sizes = [2, 384], strides = [1, 1]} : vector<16x384xf32> to vector<2x384xf32>
    %c1_48 = arith.constant 1 : index
    %c0_49 = arith.constant 0 : index
    %176 = vector.load %arg7[%c1_48, %c0_49] : memref<8x384xf32, #tpu.memory_space<vmem>>, vector<1x128xf32>
    %177 = vector.extract_strided_slice %175 {offsets = [0, 0], sizes = [2, 128], strides = [1, 1]} : vector<2x384xf32> to vector<2x128xf32>
    %178 = vector.extract_strided_slice %174 {offsets = [0, 0], sizes = [2, 128], strides = [1, 1]} : vector<2x384xf32> to vector<2x128xf32>
    %179 = arith.addf %177, %178 : vector<2x128xf32>
    %180 = arith.negf %179 : vector<2x128xf32>
    %181 = math.exp %180 : vector<2x128xf32>
    %cst_50 = arith.constant 1.000000e+00 : f32
    %182 = vector.broadcast %cst_50 : f32 to vector<2x128xf32>
    %183 = arith.addf %182, %181 : vector<2x128xf32>
    %184 = arith.divf %182, %183 : vector<2x128xf32>
    %185 = vector.extract_strided_slice %175 {offsets = [0, 128], sizes = [2, 128], strides = [1, 1]} : vector<2x384xf32> to vector<2x128xf32>
    %186 = vector.extract_strided_slice %174 {offsets = [0, 128], sizes = [2, 128], strides = [1, 1]} : vector<2x384xf32> to vector<2x128xf32>
    %187 = arith.addf %185, %186 : vector<2x128xf32>
    %188 = arith.negf %187 : vector<2x128xf32>
    %189 = math.exp %188 : vector<2x128xf32>
    %cst_51 = arith.constant 1.000000e+00 : f32
    %190 = vector.broadcast %cst_51 : f32 to vector<2x128xf32>
    %191 = arith.addf %190, %189 : vector<2x128xf32>
    %192 = arith.divf %190, %191 : vector<2x128xf32>
    %193 = vector.extract_strided_slice %175 {offsets = [0, 256], sizes = [2, 128], strides = [1, 1]} : vector<2x384xf32> to vector<2x128xf32>
    %194 = vector.extract_strided_slice %174 {offsets = [0, 256], sizes = [2, 128], strides = [1, 1]} : vector<2x384xf32> to vector<2x128xf32>
    %195 = vector.broadcast %176 : vector<1x128xf32> to vector<2x128xf32>
    %196 = arith.addf %194, %195 : vector<2x128xf32>
    %197 = arith.mulf %184, %196 : vector<2x128xf32>
    %198 = arith.addf %193, %197 : vector<2x128xf32>
    %199 = math.tanh %198 : vector<2x128xf32>
    %cst_52 = arith.constant 1.000000e+00 : f32
    %200 = vector.broadcast %cst_52 : f32 to vector<2x128xf32>
    %201 = arith.subf %200, %192 : vector<2x128xf32>
    %202 = arith.mulf %201, %199 : vector<2x128xf32>
    %203 = arith.mulf %192, %171 : vector<2x128xf32>
    %204 = arith.addf %202, %203 : vector<2x128xf32>
    %205 = vector.extract_strided_slice %204 {offsets = [0, 0], sizes = [2, 32], strides = [1, 1]} : vector<2x128xf32> to vector<2x32xf32>
    %c0_53 = arith.constant 0 : index
    %c0_54 = arith.constant 0 : index
    %206 = vector.load %arg2[%c0_53, %c0_54] : memref<32x384xf32, #tpu.memory_space<vmem>>, vector<32x384xf32>
    %cst_55 = arith.constant dense<0.000000e+00> : vector<2x384xf32>
    %207 = tpu.matmul %205, %206, %cst_55 {dimension_numbers = #tpu.dot_dimension_numbers<[1], [0], [0], [1], [0, 0, 1, 1], [], []>} : vector<2x32xf32>, vector<32x384xf32>, vector<2x384xf32> -> vector<2x384xf32>
    %208 = vector.extract_strided_slice %5 {offsets = [12, 0], sizes = [2, 384], strides = [1, 1]} : vector<16x384xf32> to vector<2x384xf32>
    %c1_56 = arith.constant 1 : index
    %c0_57 = arith.constant 0 : index
    %209 = vector.load %arg7[%c1_56, %c0_57] : memref<8x384xf32, #tpu.memory_space<vmem>>, vector<1x128xf32>
    %210 = vector.extract_strided_slice %208 {offsets = [0, 0], sizes = [2, 128], strides = [1, 1]} : vector<2x384xf32> to vector<2x128xf32>
    %211 = vector.extract_strided_slice %207 {offsets = [0, 0], sizes = [2, 128], strides = [1, 1]} : vector<2x384xf32> to vector<2x128xf32>
    %212 = arith.addf %210, %211 : vector<2x128xf32>
    %213 = arith.negf %212 : vector<2x128xf32>
    %214 = math.exp %213 : vector<2x128xf32>
    %cst_58 = arith.constant 1.000000e+00 : f32
    %215 = vector.broadcast %cst_58 : f32 to vector<2x128xf32>
    %216 = arith.addf %215, %214 : vector<2x128xf32>
    %217 = arith.divf %215, %216 : vector<2x128xf32>
    %218 = vector.extract_strided_slice %208 {offsets = [0, 128], sizes = [2, 128], strides = [1, 1]} : vector<2x384xf32> to vector<2x128xf32>
    %219 = vector.extract_strided_slice %207 {offsets = [0, 128], sizes = [2, 128], strides = [1, 1]} : vector<2x384xf32> to vector<2x128xf32>
    %220 = arith.addf %218, %219 : vector<2x128xf32>
    %221 = arith.negf %220 : vector<2x128xf32>
    %222 = math.exp %221 : vector<2x128xf32>
    %cst_59 = arith.constant 1.000000e+00 : f32
    %223 = vector.broadcast %cst_59 : f32 to vector<2x128xf32>
    %224 = arith.addf %223, %222 : vector<2x128xf32>
    %225 = arith.divf %223, %224 : vector<2x128xf32>
    %226 = vector.extract_strided_slice %208 {offsets = [0, 256], sizes = [2, 128], strides = [1, 1]} : vector<2x384xf32> to vector<2x128xf32>
    %227 = vector.extract_strided_slice %207 {offsets = [0, 256], sizes = [2, 128], strides = [1, 1]} : vector<2x384xf32> to vector<2x128xf32>
    %228 = vector.broadcast %209 : vector<1x128xf32> to vector<2x128xf32>
    %229 = arith.addf %227, %228 : vector<2x128xf32>
    %230 = arith.mulf %217, %229 : vector<2x128xf32>
    %231 = arith.addf %226, %230 : vector<2x128xf32>
    %232 = math.tanh %231 : vector<2x128xf32>
    %cst_60 = arith.constant 1.000000e+00 : f32
    %233 = vector.broadcast %cst_60 : f32 to vector<2x128xf32>
    %234 = arith.subf %233, %225 : vector<2x128xf32>
    %235 = arith.mulf %234, %232 : vector<2x128xf32>
    %236 = arith.mulf %225, %204 : vector<2x128xf32>
    %237 = arith.addf %235, %236 : vector<2x128xf32>
    %238 = vector.extract_strided_slice %237 {offsets = [0, 0], sizes = [2, 32], strides = [1, 1]} : vector<2x128xf32> to vector<2x32xf32>
    %c0_61 = arith.constant 0 : index
    %c0_62 = arith.constant 0 : index
    %239 = vector.load %arg2[%c0_61, %c0_62] : memref<32x384xf32, #tpu.memory_space<vmem>>, vector<32x384xf32>
    %cst_63 = arith.constant dense<0.000000e+00> : vector<2x384xf32>
    %240 = tpu.matmul %238, %239, %cst_63 {dimension_numbers = #tpu.dot_dimension_numbers<[1], [0], [0], [1], [0, 0, 1, 1], [], []>} : vector<2x32xf32>, vector<32x384xf32>, vector<2x384xf32> -> vector<2x384xf32>
    %241 = vector.extract_strided_slice %5 {offsets = [14, 0], sizes = [2, 384], strides = [1, 1]} : vector<16x384xf32> to vector<2x384xf32>
    %c1_64 = arith.constant 1 : index
    %c0_65 = arith.constant 0 : index
    %242 = vector.load %arg7[%c1_64, %c0_65] : memref<8x384xf32, #tpu.memory_space<vmem>>, vector<1x128xf32>
    %243 = vector.extract_strided_slice %241 {offsets = [0, 0], sizes = [2, 128], strides = [1, 1]} : vector<2x384xf32> to vector<2x128xf32>
    %244 = vector.extract_strided_slice %240 {offsets = [0, 0], sizes = [2, 128], strides = [1, 1]} : vector<2x384xf32> to vector<2x128xf32>
    %245 = arith.addf %243, %244 : vector<2x128xf32>
    %246 = arith.negf %245 : vector<2x128xf32>
    %247 = math.exp %246 : vector<2x128xf32>
    %cst_66 = arith.constant 1.000000e+00 : f32
    %248 = vector.broadcast %cst_66 : f32 to vector<2x128xf32>
    %249 = arith.addf %248, %247 : vector<2x128xf32>
    %250 = arith.divf %248, %249 : vector<2x128xf32>
    %251 = vector.extract_strided_slice %241 {offsets = [0, 128], sizes = [2, 128], strides = [1, 1]} : vector<2x384xf32> to vector<2x128xf32>
    %252 = vector.extract_strided_slice %240 {offsets = [0, 128], sizes = [2, 128], strides = [1, 1]} : vector<2x384xf32> to vector<2x128xf32>
    %253 = arith.addf %251, %252 : vector<2x128xf32>
    %254 = arith.negf %253 : vector<2x128xf32>
    %255 = math.exp %254 : vector<2x128xf32>
    %cst_67 = arith.constant 1.000000e+00 : f32
    %256 = vector.broadcast %cst_67 : f32 to vector<2x128xf32>
    %257 = arith.addf %256, %255 : vector<2x128xf32>
    %258 = arith.divf %256, %257 : vector<2x128xf32>
    %259 = vector.extract_strided_slice %241 {offsets = [0, 256], sizes = [2, 128], strides = [1, 1]} : vector<2x384xf32> to vector<2x128xf32>
    %260 = vector.extract_strided_slice %240 {offsets = [0, 256], sizes = [2, 128], strides = [1, 1]} : vector<2x384xf32> to vector<2x128xf32>
    %261 = vector.broadcast %242 : vector<1x128xf32> to vector<2x128xf32>
    %262 = arith.addf %260, %261 : vector<2x128xf32>
    %263 = arith.mulf %250, %262 : vector<2x128xf32>
    %264 = arith.addf %259, %263 : vector<2x128xf32>
    %265 = math.tanh %264 : vector<2x128xf32>
    %cst_68 = arith.constant 1.000000e+00 : f32
    %266 = vector.broadcast %cst_68 : f32 to vector<2x128xf32>
    %267 = arith.subf %266, %258 : vector<2x128xf32>
    %268 = arith.mulf %267, %265 : vector<2x128xf32>
    %269 = arith.mulf %258, %237 : vector<2x128xf32>
    %270 = arith.addf %268, %269 : vector<2x128xf32>
    %271 = vector.extract_strided_slice %0 {offsets = [14, 0], sizes = [2, 1], strides = [1, 1]} : vector<16x3xf32> to vector<2x1xf32>
    %c4 = arith.constant 4 : index
    %c0_69 = arith.constant 0 : index
    %272 = vector.load %arg7[%c4, %c0_69] : memref<8x384xf32, #tpu.memory_space<vmem>>, vector<1x384xf32>
    %273 = vector.broadcast %271 : vector<2x1xf32> to vector<2x384xf32>
    %274 = vector.broadcast %272 : vector<1x384xf32> to vector<2x384xf32>
    %275 = arith.mulf %273, %274 : vector<2x384xf32>
    %c2 = arith.constant 2 : index
    %c0_70 = arith.constant 0 : index
    %276 = vector.load %arg7[%c2, %c0_70] : memref<8x384xf32, #tpu.memory_space<vmem>>, vector<1x384xf32>
    %277 = vector.broadcast %276 : vector<1x384xf32> to vector<2x384xf32>
    %278 = arith.addf %275, %277 : vector<2x384xf32>
    %279 = vector.extract_strided_slice %270 {offsets = [0, 0], sizes = [2, 32], strides = [1, 1]} : vector<2x128xf32> to vector<2x32xf32>
    %c0_71 = arith.constant 0 : index
    %c0_72 = arith.constant 0 : index
    %280 = vector.load %arg3[%c0_71, %c0_72] : memref<32x384xf32, #tpu.memory_space<vmem>>, vector<32x384xf32>
    %cst_73 = arith.constant dense<0.000000e+00> : vector<2x384xf32>
    %281 = tpu.matmul %279, %280, %cst_73 {dimension_numbers = #tpu.dot_dimension_numbers<[1], [0], [0], [1], [0, 0, 1, 1], [], []>} : vector<2x32xf32>, vector<32x384xf32>, vector<2x384xf32> -> vector<2x384xf32>
    %c3 = arith.constant 3 : index
    %c0_74 = arith.constant 0 : index
    %282 = vector.load %arg7[%c3, %c0_74] : memref<8x384xf32, #tpu.memory_space<vmem>>, vector<1x128xf32>
    %283 = vector.extract_strided_slice %278 {offsets = [0, 0], sizes = [2, 128], strides = [1, 1]} : vector<2x384xf32> to vector<2x128xf32>
    %284 = vector.extract_strided_slice %281 {offsets = [0, 0], sizes = [2, 128], strides = [1, 1]} : vector<2x384xf32> to vector<2x128xf32>
    %285 = arith.addf %283, %284 : vector<2x128xf32>
    %286 = arith.negf %285 : vector<2x128xf32>
    %287 = math.exp %286 : vector<2x128xf32>
    %cst_75 = arith.constant 1.000000e+00 : f32
    %288 = vector.broadcast %cst_75 : f32 to vector<2x128xf32>
    %289 = arith.addf %288, %287 : vector<2x128xf32>
    %290 = arith.divf %288, %289 : vector<2x128xf32>
    %291 = vector.extract_strided_slice %278 {offsets = [0, 128], sizes = [2, 128], strides = [1, 1]} : vector<2x384xf32> to vector<2x128xf32>
    %292 = vector.extract_strided_slice %281 {offsets = [0, 128], sizes = [2, 128], strides = [1, 1]} : vector<2x384xf32> to vector<2x128xf32>
    %293 = arith.addf %291, %292 : vector<2x128xf32>
    %294 = arith.negf %293 : vector<2x128xf32>
    %295 = math.exp %294 : vector<2x128xf32>
    %cst_76 = arith.constant 1.000000e+00 : f32
    %296 = vector.broadcast %cst_76 : f32 to vector<2x128xf32>
    %297 = arith.addf %296, %295 : vector<2x128xf32>
    %298 = arith.divf %296, %297 : vector<2x128xf32>
    %299 = vector.extract_strided_slice %278 {offsets = [0, 256], sizes = [2, 128], strides = [1, 1]} : vector<2x384xf32> to vector<2x128xf32>
    %300 = vector.extract_strided_slice %281 {offsets = [0, 256], sizes = [2, 128], strides = [1, 1]} : vector<2x384xf32> to vector<2x128xf32>
    %301 = vector.broadcast %282 : vector<1x128xf32> to vector<2x128xf32>
    %302 = arith.addf %300, %301 : vector<2x128xf32>
    %303 = arith.mulf %290, %302 : vector<2x128xf32>
    %304 = arith.addf %299, %303 : vector<2x128xf32>
    %305 = math.tanh %304 : vector<2x128xf32>
    %cst_77 = arith.constant 1.000000e+00 : f32
    %306 = vector.broadcast %cst_77 : f32 to vector<2x128xf32>
    %307 = arith.subf %306, %298 : vector<2x128xf32>
    %308 = arith.mulf %307, %305 : vector<2x128xf32>
    %309 = arith.mulf %298, %270 : vector<2x128xf32>
    %310 = arith.addf %308, %309 : vector<2x128xf32>
    %311 = vector.extract_strided_slice %310 {offsets = [0, 0], sizes = [2, 32], strides = [1, 1]} : vector<2x128xf32> to vector<2x32xf32>
    %c0_78 = arith.constant 0 : index
    %c0_79 = arith.constant 0 : index
    %312 = vector.load %arg5[%c0_78, %c0_79] : memref<32x32xf32, #tpu.memory_space<vmem>>, vector<32x32xf32>
    %cst_80 = arith.constant dense<0.000000e+00> : vector<2x32xf32>
    %313 = tpu.matmul %311, %312, %cst_80 {dimension_numbers = #tpu.dot_dimension_numbers<[1], [0], [0], [1], [0, 0, 1, 1], [], []>} : vector<2x32xf32>, vector<32x32xf32>, vector<2x32xf32> -> vector<2x32xf32>
    %c6 = arith.constant 6 : index
    %c0_81 = arith.constant 0 : index
    %314 = vector.load %arg7[%c6, %c0_81] : memref<8x384xf32, #tpu.memory_space<vmem>>, vector<1x32xf32>
    %315 = vector.broadcast %314 : vector<1x32xf32> to vector<2x32xf32>
    %316 = arith.addf %313, %315 : vector<2x32xf32>
    %cst_82 = arith.constant 0.000000e+00 : f32
    %317 = vector.broadcast %cst_82 : f32 to vector<2x32xf32>
    %318 = arith.maximumf %316, %317 : vector<2x32xf32>
    %c0_83 = arith.constant 0 : index
    %c0_84 = arith.constant 0 : index
    %319 = vector.load %arg9[%c0_83, %c0_84] : memref<10x32xf32, #tpu.memory_space<vmem>>, vector<2x32xf32>
    tpu.vector_store %arg9[%c0_83, %c0_84], %318 {strides = array<i32>} : memref<10x32xf32, #tpu.memory_space<vmem>>, vector<2x32xf32>,
    %c0_85 = arith.constant 0 : index
    %c0_86 = arith.constant 0 : index
    %320 = vector.load %arg4[%c0_85, %c0_86] : memref<32x384xf32, #tpu.memory_space<vmem>>, vector<32x384xf32>
    %cst_87 = arith.constant dense<0.000000e+00> : vector<2x384xf32>
    %321 = tpu.matmul %318, %320, %cst_87 {dimension_numbers = #tpu.dot_dimension_numbers<[1], [0], [0], [1], [0, 0, 1, 1], [], []>} : vector<2x32xf32>, vector<32x384xf32>, vector<2x384xf32> -> vector<2x384xf32>
    %c5 = arith.constant 5 : index
    %c0_88 = arith.constant 0 : index
    %322 = vector.load %arg7[%c5, %c0_88] : memref<8x384xf32, #tpu.memory_space<vmem>>, vector<1x384xf32>
    %323 = vector.broadcast %322 : vector<1x384xf32> to vector<2x384xf32>
    %324 = arith.addf %321, %323 : vector<2x384xf32>
    %325 = vector.extract_strided_slice %310 {offsets = [0, 0], sizes = [2, 32], strides = [1, 1]} : vector<2x128xf32> to vector<2x32xf32>
    %c0_89 = arith.constant 0 : index
    %c0_90 = arith.constant 0 : index
    %326 = vector.load %arg3[%c0_89, %c0_90] : memref<32x384xf32, #tpu.memory_space<vmem>>, vector<32x384xf32>
    %cst_91 = arith.constant dense<0.000000e+00> : vector<2x384xf32>
    %327 = tpu.matmul %325, %326, %cst_91 {dimension_numbers = #tpu.dot_dimension_numbers<[1], [0], [0], [1], [0, 0, 1, 1], [], []>} : vector<2x32xf32>, vector<32x384xf32>, vector<2x384xf32> -> vector<2x384xf32>
    %c3_92 = arith.constant 3 : index
    %c0_93 = arith.constant 0 : index
    %328 = vector.load %arg7[%c3_92, %c0_93] : memref<8x384xf32, #tpu.memory_space<vmem>>, vector<1x128xf32>
    %329 = vector.extract_strided_slice %324 {offsets = [0, 0], sizes = [2, 128], strides = [1, 1]} : vector<2x384xf32> to vector<2x128xf32>
    %330 = vector.extract_strided_slice %327 {offsets = [0, 0], sizes = [2, 128], strides = [1, 1]} : vector<2x384xf32> to vector<2x128xf32>
    %331 = arith.addf %329, %330 : vector<2x128xf32>
    %332 = arith.negf %331 : vector<2x128xf32>
    %333 = math.exp %332 : vector<2x128xf32>
    %cst_94 = arith.constant 1.000000e+00 : f32
    %334 = vector.broadcast %cst_94 : f32 to vector<2x128xf32>
    %335 = arith.addf %334, %333 : vector<2x128xf32>
    %336 = arith.divf %334, %335 : vector<2x128xf32>
    %337 = vector.extract_strided_slice %324 {offsets = [0, 128], sizes = [2, 128], strides = [1, 1]} : vector<2x384xf32> to vector<2x128xf32>
    %338 = vector.extract_strided_slice %327 {offsets = [0, 128], sizes = [2, 128], strides = [1, 1]} : vector<2x384xf32> to vector<2x128xf32>
    %339 = arith.addf %337, %338 : vector<2x128xf32>
    %340 = arith.negf %339 : vector<2x128xf32>
    %341 = math.exp %340 : vector<2x128xf32>
    %cst_95 = arith.constant 1.000000e+00 : f32
    %342 = vector.broadcast %cst_95 : f32 to vector<2x128xf32>
    %343 = arith.addf %342, %341 : vector<2x128xf32>
    %344 = arith.divf %342, %343 : vector<2x128xf32>
    %345 = vector.extract_strided_slice %324 {offsets = [0, 256], sizes = [2, 128], strides = [1, 1]} : vector<2x384xf32> to vector<2x128xf32>
    %346 = vector.extract_strided_slice %327 {offsets = [0, 256], sizes = [2, 128], strides = [1, 1]} : vector<2x384xf32> to vector<2x128xf32>
    %347 = vector.broadcast %328 : vector<1x128xf32> to vector<2x128xf32>
    %348 = arith.addf %346, %347 : vector<2x128xf32>
    %349 = arith.mulf %336, %348 : vector<2x128xf32>
    %350 = arith.addf %345, %349 : vector<2x128xf32>
    %351 = math.tanh %350 : vector<2x128xf32>
    %cst_96 = arith.constant 1.000000e+00 : f32
    %352 = vector.broadcast %cst_96 : f32 to vector<2x128xf32>
    %353 = arith.subf %352, %344 : vector<2x128xf32>
    %354 = arith.mulf %353, %351 : vector<2x128xf32>
    %355 = arith.mulf %344, %310 : vector<2x128xf32>
    %356 = arith.addf %354, %355 : vector<2x128xf32>
    %357 = vector.extract_strided_slice %356 {offsets = [0, 0], sizes = [2, 32], strides = [1, 1]} : vector<2x128xf32> to vector<2x32xf32>
    %c0_97 = arith.constant 0 : index
    %c0_98 = arith.constant 0 : index
    %358 = vector.load %arg5[%c0_97, %c0_98] : memref<32x32xf32, #tpu.memory_space<vmem>>, vector<32x32xf32>
    %cst_99 = arith.constant dense<0.000000e+00> : vector<2x32xf32>
    %359 = tpu.matmul %357, %358, %cst_99 {dimension_numbers = #tpu.dot_dimension_numbers<[1], [0], [0], [1], [0, 0, 1, 1], [], []>} : vector<2x32xf32>, vector<32x32xf32>, vector<2x32xf32> -> vector<2x32xf32>
    %c6_100 = arith.constant 6 : index
    %c0_101 = arith.constant 0 : index
    %360 = vector.load %arg7[%c6_100, %c0_101] : memref<8x384xf32, #tpu.memory_space<vmem>>, vector<1x32xf32>
    %361 = vector.broadcast %360 : vector<1x32xf32> to vector<2x32xf32>
    %362 = arith.addf %359, %361 : vector<2x32xf32>
    %cst_102 = arith.constant 0.000000e+00 : f32
    %363 = vector.broadcast %cst_102 : f32 to vector<2x32xf32>
    %364 = arith.maximumf %362, %363 : vector<2x32xf32>
    %c2_103 = arith.constant 2 : index
    %c0_104 = arith.constant 0 : index
    %365 = vector.load %arg9[%c2_103, %c0_104] : memref<10x32xf32, #tpu.memory_space<vmem>>, vector<2x32xf32>
    tpu.vector_store %arg9[%c2_103, %c0_104], %364 {strides = array<i32>} : memref<10x32xf32, #tpu.memory_space<vmem>>, vector<2x32xf32>,
    %c0_105 = arith.constant 0 : index
    %c0_106 = arith.constant 0 : index
    %366 = vector.load %arg4[%c0_105, %c0_106] : memref<32x384xf32, #tpu.memory_space<vmem>>, vector<32x384xf32>
    %cst_107 = arith.constant dense<0.000000e+00> : vector<2x384xf32>
    %367 = tpu.matmul %364, %366, %cst_107 {dimension_numbers = #tpu.dot_dimension_numbers<[1], [0], [0], [1], [0, 0, 1, 1], [], []>} : vector<2x32xf32>, vector<32x384xf32>, vector<2x384xf32> -> vector<2x384xf32>
    %c5_108 = arith.constant 5 : index
    %c0_109 = arith.constant 0 : index
    %368 = vector.load %arg7[%c5_108, %c0_109] : memref<8x384xf32, #tpu.memory_space<vmem>>, vector<1x384xf32>
    %369 = vector.broadcast %368 : vector<1x384xf32> to vector<2x384xf32>
    %370 = arith.addf %367, %369 : vector<2x384xf32>
    %371 = vector.extract_strided_slice %356 {offsets = [0, 0], sizes = [2, 32], strides = [1, 1]} : vector<2x128xf32> to vector<2x32xf32>
    %c0_110 = arith.constant 0 : index
    %c0_111 = arith.constant 0 : index
    %372 = vector.load %arg3[%c0_110, %c0_111] : memref<32x384xf32, #tpu.memory_space<vmem>>, vector<32x384xf32>
    %cst_112 = arith.constant dense<0.000000e+00> : vector<2x384xf32>
    %373 = tpu.matmul %371, %372, %cst_112 {dimension_numbers = #tpu.dot_dimension_numbers<[1], [0], [0], [1], [0, 0, 1, 1], [], []>} : vector<2x32xf32>, vector<32x384xf32>, vector<2x384xf32> -> vector<2x384xf32>
    %c3_113 = arith.constant 3 : index
    %c0_114 = arith.constant 0 : index
    %374 = vector.load %arg7[%c3_113, %c0_114] : memref<8x384xf32, #tpu.memory_space<vmem>>, vector<1x128xf32>
    %375 = vector.extract_strided_slice %370 {offsets = [0, 0], sizes = [2, 128], strides = [1, 1]} : vector<2x384xf32> to vector<2x128xf32>
    %376 = vector.extract_strided_slice %373 {offsets = [0, 0], sizes = [2, 128], strides = [1, 1]} : vector<2x384xf32> to vector<2x128xf32>
    %377 = arith.addf %375, %376 : vector<2x128xf32>
    %378 = arith.negf %377 : vector<2x128xf32>
    %379 = math.exp %378 : vector<2x128xf32>
    %cst_115 = arith.constant 1.000000e+00 : f32
    %380 = vector.broadcast %cst_115 : f32 to vector<2x128xf32>
    %381 = arith.addf %380, %379 : vector<2x128xf32>
    %382 = arith.divf %380, %381 : vector<2x128xf32>
    %383 = vector.extract_strided_slice %370 {offsets = [0, 128], sizes = [2, 128], strides = [1, 1]} : vector<2x384xf32> to vector<2x128xf32>
    %384 = vector.extract_strided_slice %373 {offsets = [0, 128], sizes = [2, 128], strides = [1, 1]} : vector<2x384xf32> to vector<2x128xf32>
    %385 = arith.addf %383, %384 : vector<2x128xf32>
    %386 = arith.negf %385 : vector<2x128xf32>
    %387 = math.exp %386 : vector<2x128xf32>
    %cst_116 = arith.constant 1.000000e+00 : f32
    %388 = vector.broadcast %cst_116 : f32 to vector<2x128xf32>
    %389 = arith.addf %388, %387 : vector<2x128xf32>
    %390 = arith.divf %388, %389 : vector<2x128xf32>
    %391 = vector.extract_strided_slice %370 {offsets = [0, 256], sizes = [2, 128], strides = [1, 1]} : vector<2x384xf32> to vector<2x128xf32>
    %392 = vector.extract_strided_slice %373 {offsets = [0, 256], sizes = [2, 128], strides = [1, 1]} : vector<2x384xf32> to vector<2x128xf32>
    %393 = vector.broadcast %374 : vector<1x128xf32> to vector<2x128xf32>
    %394 = arith.addf %392, %393 : vector<2x128xf32>
    %395 = arith.mulf %382, %394 : vector<2x128xf32>
    %396 = arith.addf %391, %395 : vector<2x128xf32>
    %397 = math.tanh %396 : vector<2x128xf32>
    %cst_117 = arith.constant 1.000000e+00 : f32
    %398 = vector.broadcast %cst_117 : f32 to vector<2x128xf32>
    %399 = arith.subf %398, %390 : vector<2x128xf32>
    %400 = arith.mulf %399, %397 : vector<2x128xf32>
    %401 = arith.mulf %390, %356 : vector<2x128xf32>
    %402 = arith.addf %400, %401 : vector<2x128xf32>
    %403 = vector.extract_strided_slice %402 {offsets = [0, 0], sizes = [2, 32], strides = [1, 1]} : vector<2x128xf32> to vector<2x32xf32>
    %c0_118 = arith.constant 0 : index
    %c0_119 = arith.constant 0 : index
    %404 = vector.load %arg5[%c0_118, %c0_119] : memref<32x32xf32, #tpu.memory_space<vmem>>, vector<32x32xf32>
    %cst_120 = arith.constant dense<0.000000e+00> : vector<2x32xf32>
    %405 = tpu.matmul %403, %404, %cst_120 {dimension_numbers = #tpu.dot_dimension_numbers<[1], [0], [0], [1], [0, 0, 1, 1], [], []>} : vector<2x32xf32>, vector<32x32xf32>, vector<2x32xf32> -> vector<2x32xf32>
    %c6_121 = arith.constant 6 : index
    %c0_122 = arith.constant 0 : index
    %406 = vector.load %arg7[%c6_121, %c0_122] : memref<8x384xf32, #tpu.memory_space<vmem>>, vector<1x32xf32>
    %407 = vector.broadcast %406 : vector<1x32xf32> to vector<2x32xf32>
    %408 = arith.addf %405, %407 : vector<2x32xf32>
    %cst_123 = arith.constant 0.000000e+00 : f32
    %409 = vector.broadcast %cst_123 : f32 to vector<2x32xf32>
    %410 = arith.maximumf %408, %409 : vector<2x32xf32>
    %c4_124 = arith.constant 4 : index
    %c0_125 = arith.constant 0 : index
    %411 = vector.load %arg9[%c4_124, %c0_125] : memref<10x32xf32, #tpu.memory_space<vmem>>, vector<2x32xf32>
    tpu.vector_store %arg9[%c4_124, %c0_125], %410 {strides = array<i32>} : memref<10x32xf32, #tpu.memory_space<vmem>>, vector<2x32xf32>,
    %c0_126 = arith.constant 0 : index
    %c0_127 = arith.constant 0 : index
    %412 = vector.load %arg4[%c0_126, %c0_127] : memref<32x384xf32, #tpu.memory_space<vmem>>, vector<32x384xf32>
    %cst_128 = arith.constant dense<0.000000e+00> : vector<2x384xf32>
    %413 = tpu.matmul %410, %412, %cst_128 {dimension_numbers = #tpu.dot_dimension_numbers<[1], [0], [0], [1], [0, 0, 1, 1], [], []>} : vector<2x32xf32>, vector<32x384xf32>, vector<2x384xf32> -> vector<2x384xf32>
    %c5_129 = arith.constant 5 : index
    %c0_130 = arith.constant 0 : index
    %414 = vector.load %arg7[%c5_129, %c0_130] : memref<8x384xf32, #tpu.memory_space<vmem>>, vector<1x384xf32>
    %415 = vector.broadcast %414 : vector<1x384xf32> to vector<2x384xf32>
    %416 = arith.addf %413, %415 : vector<2x384xf32>
    %417 = vector.extract_strided_slice %402 {offsets = [0, 0], sizes = [2, 32], strides = [1, 1]} : vector<2x128xf32> to vector<2x32xf32>
    %c0_131 = arith.constant 0 : index
    %c0_132 = arith.constant 0 : index
    %418 = vector.load %arg3[%c0_131, %c0_132] : memref<32x384xf32, #tpu.memory_space<vmem>>, vector<32x384xf32>
    %cst_133 = arith.constant dense<0.000000e+00> : vector<2x384xf32>
    %419 = tpu.matmul %417, %418, %cst_133 {dimension_numbers = #tpu.dot_dimension_numbers<[1], [0], [0], [1], [0, 0, 1, 1], [], []>} : vector<2x32xf32>, vector<32x384xf32>, vector<2x384xf32> -> vector<2x384xf32>
    %c3_134 = arith.constant 3 : index
    %c0_135 = arith.constant 0 : index
    %420 = vector.load %arg7[%c3_134, %c0_135] : memref<8x384xf32, #tpu.memory_space<vmem>>, vector<1x128xf32>
    %421 = vector.extract_strided_slice %416 {offsets = [0, 0], sizes = [2, 128], strides = [1, 1]} : vector<2x384xf32> to vector<2x128xf32>
    %422 = vector.extract_strided_slice %419 {offsets = [0, 0], sizes = [2, 128], strides = [1, 1]} : vector<2x384xf32> to vector<2x128xf32>
    %423 = arith.addf %421, %422 : vector<2x128xf32>
    %424 = arith.negf %423 : vector<2x128xf32>
    %425 = math.exp %424 : vector<2x128xf32>
    %cst_136 = arith.constant 1.000000e+00 : f32
    %426 = vector.broadcast %cst_136 : f32 to vector<2x128xf32>
    %427 = arith.addf %426, %425 : vector<2x128xf32>
    %428 = arith.divf %426, %427 : vector<2x128xf32>
    %429 = vector.extract_strided_slice %416 {offsets = [0, 128], sizes = [2, 128], strides = [1, 1]} : vector<2x384xf32> to vector<2x128xf32>
    %430 = vector.extract_strided_slice %419 {offsets = [0, 128], sizes = [2, 128], strides = [1, 1]} : vector<2x384xf32> to vector<2x128xf32>
    %431 = arith.addf %429, %430 : vector<2x128xf32>
    %432 = arith.negf %431 : vector<2x128xf32>
    %433 = math.exp %432 : vector<2x128xf32>
    %cst_137 = arith.constant 1.000000e+00 : f32
    %434 = vector.broadcast %cst_137 : f32 to vector<2x128xf32>
    %435 = arith.addf %434, %433 : vector<2x128xf32>
    %436 = arith.divf %434, %435 : vector<2x128xf32>
    %437 = vector.extract_strided_slice %416 {offsets = [0, 256], sizes = [2, 128], strides = [1, 1]} : vector<2x384xf32> to vector<2x128xf32>
    %438 = vector.extract_strided_slice %419 {offsets = [0, 256], sizes = [2, 128], strides = [1, 1]} : vector<2x384xf32> to vector<2x128xf32>
    %439 = vector.broadcast %420 : vector<1x128xf32> to vector<2x128xf32>
    %440 = arith.addf %438, %439 : vector<2x128xf32>
    %441 = arith.mulf %428, %440 : vector<2x128xf32>
    %442 = arith.addf %437, %441 : vector<2x128xf32>
    %443 = math.tanh %442 : vector<2x128xf32>
    %cst_138 = arith.constant 1.000000e+00 : f32
    %444 = vector.broadcast %cst_138 : f32 to vector<2x128xf32>
    %445 = arith.subf %444, %436 : vector<2x128xf32>
    %446 = arith.mulf %445, %443 : vector<2x128xf32>
    %447 = arith.mulf %436, %402 : vector<2x128xf32>
    %448 = arith.addf %446, %447 : vector<2x128xf32>
    %449 = vector.extract_strided_slice %448 {offsets = [0, 0], sizes = [2, 32], strides = [1, 1]} : vector<2x128xf32> to vector<2x32xf32>
    %c0_139 = arith.constant 0 : index
    %c0_140 = arith.constant 0 : index
    %450 = vector.load %arg5[%c0_139, %c0_140] : memref<32x32xf32, #tpu.memory_space<vmem>>, vector<32x32xf32>
    %cst_141 = arith.constant dense<0.000000e+00> : vector<2x32xf32>
    %451 = tpu.matmul %449, %450, %cst_141 {dimension_numbers = #tpu.dot_dimension_numbers<[1], [0], [0], [1], [0, 0, 1, 1], [], []>} : vector<2x32xf32>, vector<32x32xf32>, vector<2x32xf32> -> vector<2x32xf32>
    %c6_142 = arith.constant 6 : index
    %c0_143 = arith.constant 0 : index
    %452 = vector.load %arg7[%c6_142, %c0_143] : memref<8x384xf32, #tpu.memory_space<vmem>>, vector<1x32xf32>
    %453 = vector.broadcast %452 : vector<1x32xf32> to vector<2x32xf32>
    %454 = arith.addf %451, %453 : vector<2x32xf32>
    %cst_144 = arith.constant 0.000000e+00 : f32
    %455 = vector.broadcast %cst_144 : f32 to vector<2x32xf32>
    %456 = arith.maximumf %454, %455 : vector<2x32xf32>
    %c6_145 = arith.constant 6 : index
    %c0_146 = arith.constant 0 : index
    %457 = vector.load %arg9[%c6_145, %c0_146] : memref<10x32xf32, #tpu.memory_space<vmem>>, vector<2x32xf32>
    tpu.vector_store %arg9[%c6_145, %c0_146], %456 {strides = array<i32>} : memref<10x32xf32, #tpu.memory_space<vmem>>, vector<2x32xf32>,
    %c0_147 = arith.constant 0 : index
    %c0_148 = arith.constant 0 : index
    %458 = vector.load %arg4[%c0_147, %c0_148] : memref<32x384xf32, #tpu.memory_space<vmem>>, vector<32x384xf32>
    %cst_149 = arith.constant dense<0.000000e+00> : vector<2x384xf32>
    %459 = tpu.matmul %456, %458, %cst_149 {dimension_numbers = #tpu.dot_dimension_numbers<[1], [0], [0], [1], [0, 0, 1, 1], [], []>} : vector<2x32xf32>, vector<32x384xf32>, vector<2x384xf32> -> vector<2x384xf32>
    %c5_150 = arith.constant 5 : index
    %c0_151 = arith.constant 0 : index
    %460 = vector.load %arg7[%c5_150, %c0_151] : memref<8x384xf32, #tpu.memory_space<vmem>>, vector<1x384xf32>
    %461 = vector.broadcast %460 : vector<1x384xf32> to vector<2x384xf32>
    %462 = arith.addf %459, %461 : vector<2x384xf32>
    %463 = vector.extract_strided_slice %448 {offsets = [0, 0], sizes = [2, 32], strides = [1, 1]} : vector<2x128xf32> to vector<2x32xf32>
    %c0_152 = arith.constant 0 : index
    %c0_153 = arith.constant 0 : index
    %464 = vector.load %arg3[%c0_152, %c0_153] : memref<32x384xf32, #tpu.memory_space<vmem>>, vector<32x384xf32>
    %cst_154 = arith.constant dense<0.000000e+00> : vector<2x384xf32>
    %465 = tpu.matmul %463, %464, %cst_154 {dimension_numbers = #tpu.dot_dimension_numbers<[1], [0], [0], [1], [0, 0, 1, 1], [], []>} : vector<2x32xf32>, vector<32x384xf32>, vector<2x384xf32> -> vector<2x384xf32>
    %c3_155 = arith.constant 3 : index
    %c0_156 = arith.constant 0 : index
    %466 = vector.load %arg7[%c3_155, %c0_156] : memref<8x384xf32, #tpu.memory_space<vmem>>, vector<1x128xf32>
    %467 = vector.extract_strided_slice %462 {offsets = [0, 0], sizes = [2, 128], strides = [1, 1]} : vector<2x384xf32> to vector<2x128xf32>
    %468 = vector.extract_strided_slice %465 {offsets = [0, 0], sizes = [2, 128], strides = [1, 1]} : vector<2x384xf32> to vector<2x128xf32>
    %469 = arith.addf %467, %468 : vector<2x128xf32>
    %470 = arith.negf %469 : vector<2x128xf32>
    %471 = math.exp %470 : vector<2x128xf32>
    %cst_157 = arith.constant 1.000000e+00 : f32
    %472 = vector.broadcast %cst_157 : f32 to vector<2x128xf32>
    %473 = arith.addf %472, %471 : vector<2x128xf32>
    %474 = arith.divf %472, %473 : vector<2x128xf32>
    %475 = vector.extract_strided_slice %462 {offsets = [0, 128], sizes = [2, 128], strides = [1, 1]} : vector<2x384xf32> to vector<2x128xf32>
    %476 = vector.extract_strided_slice %465 {offsets = [0, 128], sizes = [2, 128], strides = [1, 1]} : vector<2x384xf32> to vector<2x128xf32>
    %477 = arith.addf %475, %476 : vector<2x128xf32>
    %478 = arith.negf %477 : vector<2x128xf32>
    %479 = math.exp %478 : vector<2x128xf32>
    %cst_158 = arith.constant 1.000000e+00 : f32
    %480 = vector.broadcast %cst_158 : f32 to vector<2x128xf32>
    %481 = arith.addf %480, %479 : vector<2x128xf32>
    %482 = arith.divf %480, %481 : vector<2x128xf32>
    %483 = vector.extract_strided_slice %462 {offsets = [0, 256], sizes = [2, 128], strides = [1, 1]} : vector<2x384xf32> to vector<2x128xf32>
    %484 = vector.extract_strided_slice %465 {offsets = [0, 256], sizes = [2, 128], strides = [1, 1]} : vector<2x384xf32> to vector<2x128xf32>
    %485 = vector.broadcast %466 : vector<1x128xf32> to vector<2x128xf32>
    %486 = arith.addf %484, %485 : vector<2x128xf32>
    %487 = arith.mulf %474, %486 : vector<2x128xf32>
    %488 = arith.addf %483, %487 : vector<2x128xf32>
    %489 = math.tanh %488 : vector<2x128xf32>
    %cst_159 = arith.constant 1.000000e+00 : f32
    %490 = vector.broadcast %cst_159 : f32 to vector<2x128xf32>
    %491 = arith.subf %490, %482 : vector<2x128xf32>
    %492 = arith.mulf %491, %489 : vector<2x128xf32>
    %493 = arith.mulf %482, %448 : vector<2x128xf32>
    %494 = arith.addf %492, %493 : vector<2x128xf32>
    %495 = vector.extract_strided_slice %494 {offsets = [0, 0], sizes = [2, 32], strides = [1, 1]} : vector<2x128xf32> to vector<2x32xf32>
    %c0_160 = arith.constant 0 : index
    %c0_161 = arith.constant 0 : index
    %496 = vector.load %arg5[%c0_160, %c0_161] : memref<32x32xf32, #tpu.memory_space<vmem>>, vector<32x32xf32>
    %cst_162 = arith.constant dense<0.000000e+00> : vector<2x32xf32>
    %497 = tpu.matmul %495, %496, %cst_162 {dimension_numbers = #tpu.dot_dimension_numbers<[1], [0], [0], [1], [0, 0, 1, 1], [], []>} : vector<2x32xf32>, vector<32x32xf32>, vector<2x32xf32> -> vector<2x32xf32>
    %c6_163 = arith.constant 6 : index
    %c0_164 = arith.constant 0 : index
    %498 = vector.load %arg7[%c6_163, %c0_164] : memref<8x384xf32, #tpu.memory_space<vmem>>, vector<1x32xf32>
    %499 = vector.broadcast %498 : vector<1x32xf32> to vector<2x32xf32>
    %500 = arith.addf %497, %499 : vector<2x32xf32>
    %cst_165 = arith.constant 0.000000e+00 : f32
    %501 = vector.broadcast %cst_165 : f32 to vector<2x32xf32>
    %502 = arith.maximumf %500, %501 : vector<2x32xf32>
    %c8 = arith.constant 8 : index
    %c0_166 = arith.constant 0 : index
    %503 = vector.load %arg9[%c8, %c0_166] : memref<10x32xf32, #tpu.memory_space<vmem>>, vector<2x32xf32>
    tpu.vector_store %arg9[%c8, %c0_166], %502 {strides = array<i32>} : memref<10x32xf32, #tpu.memory_space<vmem>>, vector<2x32xf32>,
    %c0_167 = arith.constant 0 : index
    %c0_168 = arith.constant 0 : index
    %504 = vector.load %arg9[%c0_167, %c0_168] : memref<10x32xf32, #tpu.memory_space<vmem>>, vector<10x32xf32>
    %c0_169 = arith.constant 0 : index
    %c0_170 = arith.constant 0 : index
    %505 = vector.load %arg6[%c0_169, %c0_170] : memref<32x1xf32, #tpu.memory_space<vmem>>, vector<32x1xf32>
    %cst_171 = arith.constant dense<0.000000e+00> : vector<10x1xf32>
    %506 = tpu.matmul %504, %505, %cst_171 {dimension_numbers = #tpu.dot_dimension_numbers<[1], [0], [0], [1], [0, 0, 1, 1], [], []>} : vector<10x32xf32>, vector<32x1xf32>, vector<10x1xf32> -> vector<10x1xf32>
    %c7 = arith.constant 7 : index
    %c0_172 = arith.constant 0 : index
    %507 = vector.load %arg7[%c7, %c0_172] : memref<8x384xf32, #tpu.memory_space<vmem>>, vector<1x1xf32>
    %508 = vector.broadcast %507 : vector<1x1xf32> to vector<10x1xf32>
    %509 = arith.addf %506, %508 : vector<10x1xf32>
    %c0_173 = arith.constant 0 : index
    %c0_174 = arith.constant 0 : index
    %510 = vector.load %arg8[%c0_173, %c0_174] : memref<10x1xf32, #tpu.memory_space<vmem>>, vector<10x1xf32>
    tpu.vector_store %arg8[%c0_173, %c0_174], %509 {strides = array<i32>} : memref<10x1xf32, #tpu.memory_space<vmem>>, vector<10x1xf32>,
    return
  }
}

</mosaic_0001>

<bundles_post_ra>
// kernel: seq2seq_forward.1
= control target key start
LH: loop header
LB: loop body
LE: loop exit
PB: predicated region body
PF: predicated region fallthrough
CT: control target
= control target key end

     0   :  { %13 = vsyncpa [#allocation4], 0  ;;  %s5379_s0 = inlined_call_operand.vmem [shape: f32[16,3], index: 0, kind: input, shape index: {}]   ;;  %s5380_s1 = inlined_call_operand.vmem [shape: f32[3,384], index: 1, kind: input, shape index: {}]   ;;  %s5381_s2 = inlined_call_operand.hbm [shape: f32[32,384], index: 2, kind: input, shape index: {}]   ;;  %s5382_s3 = inlined_call_operand.hbm [shape: f32[32,384], index: 3, kind: input, shape index: {}]   ;;  %s5383_s4 = inlined_call_operand.hbm [shape: f32[32,384], index: 4, kind: input, shape index: {}]   ;;  %s5384_s5 = inlined_call_operand.vmem [shape: f32[32,32], index: 5, kind: input, shape index: {}]   ;;  %s5385_s6 = inlined_call_operand.vmem [shape: f32[32,1], index: 6, kind: input, shape index: {}]   ;;  %s5386_s7 = inlined_call_operand.vmem [shape: f32[8,384], index: 7, kind: input, shape index: {}]   ;;  %s5387_s8 = inlined_call_operand.vmem [shape: f32[10,1], index: 8, kind: output, shape index: {}]  }
   0x1   :  { %14 = vsyncpa [#allocation6], 0  ;;  %s4765_s27 = smov [#allocation5]   ;;  %s4766_s29 = smov [#allocation3]  }
   0x2   :  { %s36_s28 = sshll.u32 %s4765_s27, 4  ;;  %s24_s30 = sshll.u32 %s4766_s29, 4  ;;  %s37_s28 = int_to_ptr.vmem [resolvable:$true] %s36_s28  ;;  %s4819_s30 = int_to_ptr.vmem [resolvable:$true] %s24_s30 }
   0x3   :  { %s4695_s11 = scalar_lea.hbm %s5382_s3, 1536 }
   0x4   :  { %p4696_p0 = scmp.ne.s32.totalorder %s5382_s3, %s4695_s11  ;;  %p4699_p1 = scmp.lt.u32.totalorder %s4695_s11, %s5382_s3 }
   0x6   :  { %p4701_p2 = pnand %p4699_p1, %p4696_p0 }
   0x8   :  { %4704 = shalt.err (!%p4701_p2)
}
   0x9   :  { %s4705_s16 = scalar_lea.vmem %s37_s28, 1536  ;;  %p4710_p4 = scmp.lt.s32.totalorder %s37_s28, %s37_s28 }
   0xa   :  { %p4706_p3 = scmp.ne.s32.totalorder %s37_s28, %s4705_s16  ;;  %p4711_p5 = scmp.lt.s32.totalorder %s4705_s16, %s4705_s16 }
   0xc   :  { %p4712_p6 = por %p4711_p5, %p4710_p4 }
   0xe   :  { %p4713_p7 = pnand %p4712_p6, %p4706_p3 }
  0x10   :  { %4716 = shalt.err (!%p4713_p7)
}
  0x11   :  { %s4767_s17 = smov 384   ;;  %s4768_s18 = smov 24  }
  0x12   :  { %42 = dma.hbm_to_vmem [thread:$0]  %s5382_s3, 1536, %s37_s28, [#allocation6], %s4767_s17, %s4767_s17, %s4768_s18  }
  0x13   :  { %s4717_s23 = scalar_lea.hbm %s5381_s2, 1536 }
  0x14   :  { %p4718_p8 = scmp.ne.s32.totalorder %s5381_s2, %s4717_s23  ;;  %p4721_p9 = scmp.lt.u32.totalorder %s4717_s23, %s5381_s2 }
  0x16   :  { %p4723_p10 = pnand %p4721_p9, %p4718_p8 }
  0x18   :  { %4726 = shalt.err (!%p4723_p10)
}
  0x19   :  { %s4727_s29 = scalar_lea.vmem %s4819_s30, 1536  ;;  %p4732_p12 = scmp.lt.s32.totalorder %s4819_s30, %s4819_s30 }
  0x1a   :  { %p4728_p11 = scmp.ne.s32.totalorder %s4819_s30, %s4727_s29  ;;  %p4733_p13 = scmp.lt.s32.totalorder %s4727_s29, %s4727_s29 }
  0x1c   :  { %p4734_p0 = por %p4733_p13, %p4732_p12 }
  0x1e   :  { %p4735_p1 = pnand %p4734_p0, %p4728_p11 }
  0x20   :  { %4738 = shalt.err (!%p4735_p1)
}
  0x21   :  { %30 = dma.hbm_to_vmem [thread:$0]  %s5381_s2, 1536, %s4819_s30, [#allocation4], %s4767_s17, %s4767_s17, %s4768_s18  }
  0x22   :  { %s4769_s9 = smov [#allocation7]   ;;  %s4739_s13 = scalar_lea.hbm %s5383_s4, 1536 }
  0x23   :  { %s48_s10 = sshll.u32 %s4769_s9, 4  ;;  %p4740_p2 = scmp.ne.s32.totalorder %s5383_s4, %s4739_s13  ;;  %s49_s10 = int_to_ptr.vmem [resolvable:$true] %s48_s10 }
  0x24   :  { %p4743_p3 = scmp.lt.u32.totalorder %s4739_s13, %s5383_s4 }
  0x26   :  { %p4745_p4 = pnand %p4743_p3, %p4740_p2 }
  0x28   :  { %4748 = shalt.err (!%p4745_p4)
}
  0x29   :  { %s4749_s20 = scalar_lea.vmem %s49_s10, 1536  ;;  %p4754_p6 = scmp.lt.s32.totalorder %s49_s10, %s49_s10 }
  0x2a   :  { %p4750_p5 = scmp.ne.s32.totalorder %s49_s10, %s4749_s20  ;;  %p4755_p7 = scmp.lt.s32.totalorder %s4749_s20, %s4749_s20 }
  0x2c   :  { %p4756_p8 = por %p4755_p7, %p4754_p6 }
  0x2e   :  { %p4757_p9 = pnand %p4756_p8, %p4750_p5 }
  0x30   :  { %4760 = shalt.err (!%p4757_p9)
}
  0x31   :  { %54 = dma.hbm_to_vmem [thread:$0]  %s5383_s4, 1536, %s49_s10, [#allocation6], %s4767_s17, %s4767_s17, %s4768_s18  }
  0x32   :  { %4761 = dma.done.wait [#allocation4], 1536  }
  0x33   :  { %4762 = vsyncadd [#allocation4], 4294965760 }
  0x34   :  { %4763 = dma.done.wait [#allocation6], 3072  }
  0x35   :  { %4764 = vsyncadd [#allocation6], 4294964224  ;;  %v4770_v0 = vmov 0.0   ;;  %v72_v1 = vld [vmem:[%s5380_s1] sm:$0x77]  ;;  %vm101_vm0 = vcmask 1042432   ;;  %v76_v25 = vlaneseq }
  0x36   :  { %172 = vmatprep.mubr.f32.mxu0 %v4770_v0  ;;  %v70_v2 = vld [vmem:[%s5379_s0] sm:$0xff]  ;;  %vm94_vm1 = vcmask 23552   ;;  %v261_v3 = vld [vmem:[#allocation3 + $0x8] sm:$0xff]  ;;  %v93_v4 = vcombine.high %v72_v1, %v72_v1  ;;  %v263_v7 = vld [vmem:[#allocation3 + $0x18] sm:$0xff]  ;;  %v4771_v23 = vmov 0.0|0.0   ;;  %vm4772_vm2 = vmmov 0  }
  0x37   :  { %v264_v5 = vld [vmem:[#allocation3 + $0x20] sm:$0xff]  ;;  %4006 = vmatprep.mubr.msk.f32.mxu1 %vm94_vm1, %v70_v2  ;;  %v267_v10 = vld [vmem:[#allocation3 + $0x38] sm:$0xff]  ;;  %v270_v11 = vld [vmem:[#allocation3 + $0x50] sm:$0xff]  ;;  %v77_v26 = vshrl.u32 %v76_v25, 7  ;;  %vm272_vm3 = vcmask 261120   ;;  %vm1989_vm4 = vcmask 254976  }
  0x38   :  { %v260_v6 = vld [vmem:[#allocation3] sm:$0xff]  ;;  %v4879_v8 = vpack.c.bf16 %v264_v5, %v261_v3  ;;  %3807 = vmatprep.subr.msk.mxu0 %vm101_vm0, %v93_v4  ;;  %v4884_v12 = vpack.c.bf16 %v270_v11, %v267_v10  ;;  %v266_v13 = vld [vmem:[#allocation3 + $0x30] sm:$0xff]  ;;  %v269_v14 = vld [vmem:[#allocation3 + $0x48] sm:$0xff]  ;;  %vm3799_vm5 = vcmask 1024   ;;  %vm3797_vm6 = vcmask 7168  }
  0x39   :  { %v4881_v9 = vpack.c.bf16 %v263_v7, %v260_v6  ;;  %v73_v15 = vld [vmem:[%s5380_s1 + $0x8] sm:$0x7]  ;;  %3808 = vmatpush1.msk.msra.mxu0 %vm101_vm0, %v72_v1  ;;  %v262_v16 = vld [vmem:[#allocation3 + $0x10] sm:$0xff]  ;;  %v4902_v20 = vpack.c.bf16 %v269_v14, %v266_v13  ;;  %v268_v21 = vld [vmem:[#allocation3 + $0x40] sm:$0xff]  ;;  %v4935_v27 = vsub.s32 2, %v77_v26  ;;  %v4940_v29 = vsub.s32 0, %v77_v26 }
  0x3a   :  { %4004 = vmatprep.subr.msk.mxu1 %vm101_vm0, %v73_v15  ;;  %v265_v17 = vld [vmem:[#allocation3 + $0x28] sm:$0xff]  ;;  %3809 = vmatmul.mubr.msk.f32.vlgmr.msra.gmra.mrb[0].mxu0 %vm94_vm1, %v70_v2  ;;  %v271_v22 = vld [vmem:[#allocation3 + $0x58] sm:$0xff]  ;;  %v4942_v31 = vsub.s32 1, %v77_v26  ;;  %v4962_v56 = vld [vmem:[%s5386_s7 + $0x1] ss:$0 sm:$0xff] }
  0x3b   :  { %4263 = vmatprep.subr.bf16.mxu0 %v4879_v8  ;;  %v4893_v18 = vpack.c.bf16 %v265_v17, %v262_v16  ;;  %178 = vmatprep.mubr.f32.mxu0 %v4770_v0  ;;  %v4900_v19 = vld [vmem:[%s5379_s0 + $0x8] sm:$0xff]  ;;  %v4912_v24 = vpack.c.bf16 %v271_v22, %v268_v21 }
  0x3c   :  { %4265 = vmatpush1.bf16.msra.mxu0 %v4881_v9  ;;  %4005 = vmatpush3.msk.msra.mxu1 %vm101_vm0, %v73_v15  ;;  %v74_v28 = vld [vmem:[%s5386_s7] ss:$8 sm:$0x7] }
  0x3d   :  { %4267 = vmatprep.subr.bf16.mxu0 %v4884_v12  ;;  %4270 = vmatprep.subr.bf16.mxu1 %v4771_v23  ;;  %v87_v32 = vrot.slane %v74_v28, %v4935_v27  ;;  %v79_v34 = vrot.slane %v74_v28, %v4940_v29  ;;  %v83_v36 = vrot.slane %v74_v28, %v4942_v31 }
  0x3e   :  { %4007 = vmatmul.mubr.msk.f32.vlgmr.msra.gmra.mrb[0].mxu1 %vm94_vm1, %v4900_v19  ;;  %3810 = vmatmul.mubr.msk.f32.gmra.mrb[2].mxu0 %vm94_vm1, %v4900_v19 }
  0x3f   :  { %4272 = vmatpush3.bf16.msra.mxu1 %v4893_v18  ;;  %340 = vmatprep.mubr.f32.mxu0 %v4770_v0 }
  0x40   :  { %4269 = vmatpush1.bf16.msra.mxu0 %v4902_v20  ;;  %4273 = vmatprep.subr.bf16.mxu1 %v4771_v23 }
  0x41   :  { %4017 = vmatprep.mubr.msk.f32.mxu1 %vm4772_vm2, %v4770_v0  ;;  %4277 = vmatprep.subr.bf16.mxu0 %v4879_v8 }
  0x43   :  { %341 = vmatmul.mubr.f32.vlgmr.msra.gmra.mrb[4].mxu0 %v4770_v0  ;;  %4275 = vmatpush3.bf16.msra.mxu1 %v4912_v24 }
  0x44   :  { %4284 = vmatprep.subr.bf16.mxu1 %v4771_v23  ;;  %4279 = vmatpush1.bf16.msra.mxu0 %v4881_v9 }
  0x45   :  { %4281 = vmatprep.subr.bf16.mxu0 %v4884_v12  ;;  %507 = vmatprep.mubr.f32.mxu0 %v4770_v0 }
  0x46   :  { %4018 = vmatmul.mubr.f32.vlgmr.msra.gmra.mrb[2].mxu1 %v4770_v0 }
  0x47   :  { %4286 = vmatpush3.bf16.msra.mxu1 %v4893_v18  ;;  %4028 = vmatprep.mubr.msk.f32.mxu1 %vm4772_vm2, %v4770_v0 }
  0x48   :  { %4287 = vmatprep.subr.bf16.mxu1 %v4771_v23  ;;  %4283 = vmatpush1.bf16.msra.mxu0 %v4902_v20 }
  0x49   :  { %4291 = vmatprep.subr.bf16.mxu0 %v4879_v8 }
  0x4b   :  { %4289 = vmatpush3.bf16.msra.mxu1 %v4912_v24 }
  0x4c   :  { %4298 = vmatprep.subr.bf16.mxu1 %v4771_v23 }
 0x10d   :  { %v174_v30 = vpop.f32.mrb[0].mxu0 }
 0x10e   :  { %v176_v33 = vpop.f32.mrb[1].mxu0  ;;  %v4953_v43 = vadd.f32 %v174_v30, %v79_v34 }
 0x10f   :  { %v4956_v47 = vadd.f32 %v176_v33, %v83_v36 }
 0x111   :  { %v4008_v35 = vpop.f32.mrb[0].mxu1  ;;  %v180_v37 = vpop.f32.mrb[2].mxu0 }
 0x112   :  { %v4947_v38 = vadd.f32 %v4008_v35, %v87_v32  ;;  %v251_v39 = vpop.f32.mrb[1].mxu1  ;;  %v4949_v40 = vadd.f32 %v180_v37, %v79_v34  ;;  %v182_v41 = vpop.f32.mrb[3].mxu0 }
 0x113   :  { %v4951_v42 = vadd.f32 %v182_v41, %v83_v36  ;;  %v4965_v60 = vadd.f32 %v251_v39, %v87_v32 }
 0x116   :  { %v342_v44 = vpop.f32.mrb[4].mxu0 }
 0x117   :  { %v418_v45 = vadd.f32 %v342_v44, %v4953_v43  ;;  %v344_v46 = vpop.f32.mrb[5].mxu0 }
 0x118   :  { %v425_v50 = vadd.f32 %v344_v46, %v4956_v47 }
 0x119   :  { %v3814_v48 = vmul.f32 -1.442695, %v418_v45  ;;  %v413_v49 = vpop.f32.mrb[2].mxu1 }
 0x11a   :  { %v4019_v51 = vpop.f32.mrb[3].mxu1  ;;  %v3815_v52 = vmul.f32 -1.442695, %v425_v50  ;;  %v432_v58 = vadd.f32 %v4962_v56, %v413_v49 }
 0x11b   :  { %4565 = vpow2.f32 %v3814_v48 }
 0x11c   :  { %4567 = vpow2.f32 %v3815_v52 }
 0x125   :  { %v4566_v53 = vpop.eup %4565 }
 0x126   :  { %v422_v54 = vadd.f32 1.0, %v4566_v53  ;;  %v4568_v55 = vpop.eup %4567 }
 0x127   :  { %v429_v57 = vadd.f32 1.0, %v4568_v55 }
 0x128   :  { %4569 = vrcp.f32 %v422_v54 }
 0x129   :  { %4571 = vrcp.f32 %v429_v57 }
 0x132   :  { %v4570_v59 = vpop.eup %4569 }
 0x133   :  { %v433_v61 = vmul.f32 %v4570_v59, %v432_v58  ;;  %v4572_v63 = vpop.eup %4571 }
 0x134   :  { %v436_v1 = vsub.f32 1.0, %v4572_v63  ;;  %v438_v4 = vmul.f32 0.0, %v4572_v63 }
 0x135   :  { %v434_v62 = vadd.f32 %v433_v61, %v4965_v60 }
 0x137   :  { %4573 = vtanh.f32 %v434_v62 }
 0x141   :  { %v4574_v2 = vpop.eup %4573 }
 0x142   :  { %v437_v3 = vmul.f32 %v4574_v2, %v436_v1 }
 0x144   :  { %v439_v5 = vadd.f32 %v438_v4, %v437_v3 }
 0x146   :  { %3816 = vmatmul.mubr.msk.f32.vlgmr.msra.gmra.mrb[6].mxu0 %vm272_vm3, %v439_v5  ;;  %4029 = vmatmul.mubr.msk.f32.vlgmr.msra.gmra.mrb[4].mxu1 %vm272_vm3, %v439_v5  ;;  %v613_v34 = vrot.slane %v439_v5, 6 }
 0x147   :  { %4293 = vmatpush1.bf16.msra.mxu0 %v4881_v9  ;;  %4300 = vmatpush3.bf16.msra.mxu1 %v4893_v18 }
 0x148   :  { %4295 = vmatprep.subr.bf16.mxu0 %v4884_v12  ;;  %4301 = vmatprep.subr.bf16.mxu1 %v4771_v23 }
 0x149   :  { %685 = vmatprep.mubr.f32.mxu0 %v4770_v0  ;;  %4039 = vmatprep.mubr.msk.f32.mxu1 %vm4772_vm2, %v4770_v0 }
 0x14b   :  { %4297 = vmatpush1.bf16.msra.mxu0 %v4902_v20  ;;  %4303 = vmatpush3.bf16.msra.mxu1 %v4912_v24 }
 0x14c   :  { %4305 = vmatprep.subr.bf16.mxu0 %v4879_v8  ;;  %4312 = vmatprep.subr.bf16.mxu1 %v4771_v23 }
 0x219   :  { %v509_v6 = vpop.f32.mrb[6].mxu0  ;;  %v580_v7 = vpop.f32.mrb[4].mxu1 }
 0x21a   :  { %v585_v10 = vrot.slane %v509_v6, 6  ;;  %v511_v11 = vpop.f32.mrb[7].mxu0  ;;  %v4030_v13 = vpop.f32.mrb[5].mxu1  ;;  %v604_v30 = vadd.f32 %v580_v7, %v4962_v56 }
 0x21b   :  { %v595_v14 = vrot.slane %v511_v11, 6 }
 0x21c   :  { %v587_v15 = vadd.f32 %v585_v10, %v4953_v43  ;;  %v606_v32 = vrot.slane %v604_v30, 6 }
 0x21d   :  { %v597_v16 = vadd.f32 %v595_v14, %v4956_v47 }
 0x21e   :  { %v3818_v17 = vmul.f32 -1.442695, %v587_v15 }
 0x21f   :  { %v3819_v21 = vmul.f32 -1.442695, %v597_v16 }
 0x220   :  { %4575 = vpow2.f32 %v3818_v17 }
 0x221   :  { %4577 = vpow2.f32 %v3819_v21 }
 0x22a   :  { %v4576_v22 = vpop.eup %4575 }
 0x22b   :  { %v4578_v25 = vpop.eup %4577  ;;  %v591_v26 = vadd.f32 1.0, %v4576_v22 }
 0x22c   :  { %v601_v28 = vadd.f32 1.0, %v4578_v25 }
 0x22d   :  { %4579 = vrcp.f32 %v591_v26 }
 0x22e   :  { %4581 = vrcp.f32 %v601_v28 }
 0x237   :  { %v4580_v33 = vpop.eup %4579 }
 0x238   :  { %v4582_v35 = vpop.eup %4581  ;;  %v608_v36 = vmul.f32 %v4580_v33, %v606_v32 }
 0x239   :  { %v615_v37 = vmul.f32 %v4582_v35, %v613_v34  ;;  %v611_v41 = vsub.f32 1.0, %v4582_v35 }
 0x23a   :  { %v609_v39 = vadd.f32 %v608_v36, %v4965_v60 }
 0x23c   :  { %4583 = vtanh.f32 %v609_v39 }
 0x246   :  { %v4584_v44 = vpop.eup %4583 }
 0x247   :  { %v612_v45 = vmul.f32 %v4584_v44, %v611_v41 }
 0x249   :  { %v616_v46 = vadd.f32 %v615_v37, %v612_v45 }
 0x24b   :  { %v618_v48 = vrot.slane %v616_v46, 2  ;;  %v791_v5 = vrot.slane %v616_v46, 6 }
 0x24d   :  { %3820 = vmatmul.mubr.msk.f32.vlgmr.msra.gmra.mrb[8].mxu0 %vm272_vm3, %v618_v48  ;;  %4040 = vmatmul.mubr.msk.f32.vlgmr.msra.gmra.mrb[6].mxu1 %vm272_vm3, %v618_v48 }
 0x24e   :  { %4307 = vmatpush1.bf16.msra.mxu0 %v4881_v9  ;;  %4314 = vmatpush3.bf16.msra.mxu1 %v4893_v18 }
 0x24f   :  { %4309 = vmatprep.subr.bf16.mxu0 %v4884_v12  ;;  %4315 = vmatprep.subr.bf16.mxu1 %v4771_v23 }
 0x250   :  { %863 = vmatprep.mubr.f32.mxu0 %v4770_v0  ;;  %4050 = vmatprep.mubr.msk.f32.mxu1 %vm4772_vm2, %v4770_v0 }
 0x252   :  { %4311 = vmatpush1.bf16.msra.mxu0 %v4902_v20  ;;  %4317 = vmatpush3.bf16.msra.mxu1 %v4912_v24 }
 0x253   :  { %4319 = vmatprep.subr.bf16.mxu0 %v4879_v8  ;;  %4326 = vmatprep.subr.bf16.mxu1 %v4771_v23 }
 0x320   :  { %v687_v49 = vpop.f32.mrb[8].mxu0  ;;  %v758_v50 = vpop.f32.mrb[6].mxu1 }
 0x321   :  { %v763_v51 = vrot.slane %v687_v49, 4  ;;  %v689_v52 = vpop.f32.mrb[9].mxu0  ;;  %v4041_v53 = vpop.f32.mrb[7].mxu1  ;;  %v782_v2 = vadd.f32 %v758_v50, %v4962_v56 }
 0x322   :  { %v773_v54 = vrot.slane %v689_v52, 4 }
 0x323   :  { %v765_v55 = vadd.f32 %v763_v51, %v4953_v43  ;;  %v784_v3 = vrot.slane %v782_v2, 4 }
 0x324   :  { %v775_v57 = vadd.f32 %v773_v54, %v4956_v47 }
 0x325   :  { %v3822_v58 = vmul.f32 -1.442695, %v765_v55 }
 0x326   :  { %v3823_v59 = vmul.f32 -1.442695, %v775_v57 }
 0x327   :  { %4585 = vpow2.f32 %v3822_v58 }
 0x328   :  { %4587 = vpow2.f32 %v3823_v59 }
 0x331   :  { %v4586_v61 = vpop.eup %4585 }
 0x332   :  { %v4588_v62 = vpop.eup %4587  ;;  %v769_v63 = vadd.f32 1.0, %v4586_v61 }
 0x333   :  { %v779_v1 = vadd.f32 1.0, %v4588_v62 }
 0x334   :  { %4589 = vrcp.f32 %v769_v63 }
 0x335   :  { %4591 = vrcp.f32 %v779_v1 }
 0x33e   :  { %v4590_v4 = vpop.eup %4589 }
 0x33f   :  { %v4592_v6 = vpop.eup %4591  ;;  %v786_v7 = vmul.f32 %v4590_v4, %v784_v3 }
 0x340   :  { %v793_v10 = vmul.f32 %v4592_v6, %v791_v5  ;;  %v789_v13 = vsub.f32 1.0, %v4592_v6 }
 0x341   :  { %v787_v11 = vadd.f32 %v786_v7, %v4965_v60 }
 0x343   :  { %4593 = vtanh.f32 %v787_v11 }
 0x34d   :  { %v4594_v14 = vpop.eup %4593 }
 0x34e   :  { %v790_v15 = vmul.f32 %v4594_v14, %v789_v13 }
 0x350   :  { %v794_v16 = vadd.f32 %v793_v10, %v790_v15 }
 0x352   :  { %v796_v17 = vrot.slane %v794_v16, 4  ;;  %v969_v48 = vrot.slane %v794_v16, 6 }
 0x354   :  { %3824 = vmatmul.mubr.msk.f32.vlgmr.msra.gmra.mrb[10].mxu0 %vm272_vm3, %v796_v17  ;;  %4051 = vmatmul.mubr.msk.f32.vlgmr.msra.gmra.mrb[8].mxu1 %vm272_vm3, %v796_v17 }
 0x355   :  { %4321 = vmatpush1.bf16.msra.mxu0 %v4881_v9  ;;  %4328 = vmatpush3.bf16.msra.mxu1 %v4893_v18 }
 0x356   :  { %4323 = vmatprep.subr.bf16.mxu0 %v4884_v12  ;;  %4329 = vmatprep.subr.bf16.mxu1 %v4771_v23 }
 0x357   :  { %1041 = vmatprep.mubr.f32.mxu0 %v4770_v0  ;;  %4061 = vmatprep.mubr.msk.f32.mxu1 %vm4772_vm2, %v4770_v0 }
 0x359   :  { %4325 = vmatpush1.bf16.msra.mxu0 %v4902_v20  ;;  %4331 = vmatpush3.bf16.msra.mxu1 %v4912_v24 }
 0x35a   :  { %4333 = vmatprep.subr.bf16.mxu0 %v4879_v8  ;;  %4340 = vmatprep.subr.bf16.mxu1 %v4771_v23 }
 0x427   :  { %v865_v21 = vpop.f32.mrb[10].mxu0  ;;  %v936_v22 = vpop.f32.mrb[8].mxu1 }
 0x428   :  { %v941_v25 = vrot.slane %v865_v21, 2  ;;  %v867_v26 = vpop.f32.mrb[11].mxu0  ;;  %v4052_v28 = vpop.f32.mrb[9].mxu1  ;;  %v960_v44 = vadd.f32 %v936_v22, %v4962_v56 }
 0x429   :  { %v951_v30 = vrot.slane %v867_v26, 2 }
 0x42a   :  { %v943_v32 = vadd.f32 %v941_v25, %v4953_v43  ;;  %v962_v45 = vrot.slane %v960_v44, 2 }
 0x42b   :  { %v953_v33 = vadd.f32 %v951_v30, %v4956_v47 }
 0x42c   :  { %v3826_v34 = vmul.f32 -1.442695, %v943_v32 }
 0x42d   :  { %v3827_v35 = vmul.f32 -1.442695, %v953_v33 }
 0x42e   :  { %4595 = vpow2.f32 %v3826_v34 }
 0x42f   :  { %4597 = vpow2.f32 %v3827_v35 }
 0x438   :  { %v4596_v36 = vpop.eup %4595 }
 0x439   :  { %v4598_v37 = vpop.eup %4597  ;;  %v947_v39 = vadd.f32 1.0, %v4596_v36 }
 0x43a   :  { %v957_v41 = vadd.f32 1.0, %v4598_v37 }
 0x43b   :  { %4599 = vrcp.f32 %v947_v39 }
 0x43c   :  { %4601 = vrcp.f32 %v957_v41 }
 0x445   :  { %v4600_v46 = vpop.eup %4599 }
 0x446   :  { %v4602_v49 = vpop.eup %4601  ;;  %v964_v50 = vmul.f32 %v4600_v46, %v962_v45 }
 0x447   :  { %v971_v43 = vmul.f32 %v4602_v49, %v969_v48  ;;  %v967_v51 = vsub.f32 1.0, %v4602_v49 }
 0x448   :  { %v965_v47 = vadd.f32 %v964_v50, %v4965_v60 }
 0x44a   :  { %4603 = vtanh.f32 %v965_v47 }
 0x454   :  { %v4604_v52 = vpop.eup %4603 }
 0x455   :  { %v968_v53 = vmul.f32 %v4604_v52, %v967_v51 }
 0x457   :  { %v972_v54 = vadd.f32 %v971_v43, %v968_v53 }
 0x459   :  { %v974_v55 = vrot.slane %v972_v54, 6 }
 0x45b   :  { %3828 = vmatmul.mubr.msk.f32.vlgmr.msra.gmra.mrb[12].mxu0 %vm272_vm3, %v974_v55  ;;  %4062 = vmatmul.mubr.msk.f32.vlgmr.msra.gmra.mrb[10].mxu1 %vm272_vm3, %v974_v55 }
 0x45c   :  { %4335 = vmatpush1.bf16.msra.mxu0 %v4881_v9  ;;  %4342 = vmatpush3.bf16.msra.mxu1 %v4893_v18 }
 0x45d   :  { %4337 = vmatprep.subr.bf16.mxu0 %v4884_v12  ;;  %4343 = vmatprep.subr.bf16.mxu1 %v4771_v23 }
 0x45e   :  { %1208 = vmatprep.mubr.f32.mxu0 %v4770_v0  ;;  %4072 = vmatprep.mubr.msk.f32.mxu1 %vm4772_vm2, %v4770_v0 }
 0x460   :  { %4339 = vmatpush1.bf16.msra.mxu0 %v4902_v20  ;;  %4345 = vmatpush3.bf16.msra.mxu1 %v4912_v24 }
 0x461   :  { %4347 = vmatprep.subr.bf16.mxu0 %v4879_v8  ;;  %4354 = vmatprep.subr.bf16.mxu1 %v4771_v23 }
 0x52e   :  { %v1043_v60 = vpop.f32.mrb[12].mxu0  ;;  %v1114_v57 = vpop.f32.mrb[10].mxu1 }
 0x52f   :  { %v1118_v58 = vadd.f32 %v1043_v60, %v4949_v40  ;;  %v1045_v59 = vpop.f32.mrb[13].mxu0  ;;  %v4063_v61 = vpop.f32.mrb[11].mxu1  ;;  %v1132_v6 = vadd.f32 %v1114_v57, %v4962_v56 }
 0x530   :  { %v1125_v63 = vadd.f32 %v1045_v59, %v4951_v42 }
 0x531   :  { %v3830_v62 = vmul.f32 -1.442695, %v1118_v58 }
 0x532   :  { %v3831_v1 = vmul.f32 -1.442695, %v1125_v63 }
 0x533   :  { %4605 = vpow2.f32 %v3830_v62 }
 0x534   :  { %4607 = vpow2.f32 %v3831_v1 }
 0x53d   :  { %v4606_v2 = vpop.eup %4605 }
 0x53e   :  { %v1122_v3 = vadd.f32 1.0, %v4606_v2  ;;  %v4608_v4 = vpop.eup %4607 }
 0x53f   :  { %v1129_v5 = vadd.f32 1.0, %v4608_v4 }
 0x540   :  { %4609 = vrcp.f32 %v1122_v3 }
 0x541   :  { %4611 = vrcp.f32 %v1129_v5 }
 0x54a   :  { %v4610_v7 = vpop.eup %4609 }
 0x54b   :  { %v1133_v10 = vmul.f32 %v4610_v7, %v1132_v6  ;;  %v4612_v13 = vpop.eup %4611 }
 0x54c   :  { %v1136_v14 = vsub.f32 1.0, %v4612_v13  ;;  %v1139_v17 = vmul.f32 %v4612_v13, %v974_v55 }
 0x54d   :  { %v1134_v11 = vadd.f32 %v1133_v10, %v4947_v38 }
 0x54f   :  { %4613 = vtanh.f32 %v1134_v11 }
 0x559   :  { %v4614_v15 = vpop.eup %4613 }
 0x55a   :  { %v1137_v16 = vmul.f32 %v4614_v15, %v1136_v14 }
 0x55c   :  { %v1140_v21 = vadd.f32 %v1139_v17, %v1137_v16 }
 0x55e   :  { %3832 = vmatmul.mubr.msk.f32.vlgmr.msra.gmra.mrb[14].mxu0 %vm272_vm3, %v1140_v21  ;;  %4073 = vmatmul.mubr.msk.f32.vlgmr.msra.gmra.mrb[12].mxu1 %vm272_vm3, %v1140_v21  ;;  %v1314_v48 = vrot.slane %v1140_v21, 6 }
 0x55f   :  { %4349 = vmatpush1.bf16.msra.mxu0 %v4881_v9  ;;  %4356 = vmatpush3.bf16.msra.mxu1 %v4893_v18 }
 0x560   :  { %4351 = vmatprep.subr.bf16.mxu0 %v4884_v12  ;;  %4357 = vmatprep.subr.bf16.mxu1 %v4771_v23 }
 0x561   :  { %1386 = vmatprep.mubr.f32.mxu0 %v4770_v0  ;;  %4083 = vmatprep.mubr.msk.f32.mxu1 %vm4772_vm2, %v4770_v0 }
 0x563   :  { %4353 = vmatpush1.bf16.msra.mxu0 %v4902_v20  ;;  %4359 = vmatpush3.bf16.msra.mxu1 %v4912_v24 }
 0x564   :  { %4361 = vmatprep.subr.bf16.mxu0 %v4879_v8  ;;  %4368 = vmatprep.subr.bf16.mxu1 %v4771_v23 }
 0x631   :  { %v1210_v22 = vpop.f32.mrb[14].mxu0  ;;  %v1281_v25 = vpop.f32.mrb[12].mxu1 }
 0x632   :  { %v1286_v26 = vrot.slane %v1210_v22, 6  ;;  %v1212_v28 = vpop.f32.mrb[15].mxu0  ;;  %v4074_v30 = vpop.f32.mrb[13].mxu1  ;;  %v1305_v44 = vadd.f32 %v1281_v25, %v4962_v56  ;;  %v1721_v22 = vld [vmem:[#allocation5 + $0x8] sm:$0xff]  ;;  %v1724_v25 = vld [vmem:[#allocation5 + $0x20] sm:$0xff] }
 0x633   :  { %v1296_v32 = vrot.slane %v1212_v28, 6  ;;  %v5074_v28 = vpack.c.bf16 %v1724_v25, %v1721_v22  ;;  %v1723_v30 = vld [vmem:[#allocation5 + $0x18] sm:$0xff]  ;;  %v3845_v25 = vld [vmem:[%s5386_s7 + $0x2] ss:$8 sm:$0x7] }
 0x634   :  { %v1288_v33 = vadd.f32 %v1286_v26, %v4949_v40  ;;  %v1307_v45 = vrot.slane %v1305_v44, 6  ;;  %v1720_v26 = vld [vmem:[#allocation5] sm:$0xff] }
 0x635   :  { %v1298_v34 = vadd.f32 %v1296_v32, %v4951_v42  ;;  %v1722_v32 = vld [vmem:[#allocation5 + $0x10] sm:$0xff]  ;;  %v1728_v44 = vld [vmem:[#allocation5 + $0x40] sm:$0xff] }
 0x636   :  { %v3834_v35 = vmul.f32 -1.442695, %v1288_v33  ;;  %v1725_v33 = vld [vmem:[#allocation5 + $0x28] sm:$0xff] }
 0x637   :  { %v3835_v36 = vmul.f32 -1.442695, %v1298_v34  ;;  %v5076_v34 = vpack.c.bf16 %v1723_v30, %v1720_v26 }
 0x638   :  { %4615 = vpow2.f32 %v3834_v35  ;;  %v5078_v35 = vpack.c.bf16 %v1725_v33, %v1722_v32  ;;  %v1705_v32 = vrot.slane %v3845_v25, %v4940_v29 }
 0x639   :  { %4617 = vpow2.f32 %v3835_v36  ;;  %v1727_v36 = vld [vmem:[#allocation5 + $0x38] sm:$0xff] }
 0x642   :  { %v4616_v37 = vpop.eup %4615 }
 0x643   :  { %v4618_v39 = vpop.eup %4617  ;;  %v1292_v41 = vadd.f32 1.0, %v4616_v37  ;;  %v1730_v37 = vld [vmem:[#allocation5 + $0x50] sm:$0xff] }
 0x644   :  { %v1302_v8 = vadd.f32 1.0, %v4618_v39  ;;  %v1726_v39 = vld [vmem:[#allocation5 + $0x30] sm:$0xff] }
 0x645   :  { %4619 = vrcp.f32 %v1292_v41  ;;  %v5081_v41 = vpack.c.bf16 %v1730_v37, %v1727_v36  ;;  %v1709_v36 = vrot.slane %v3845_v25, %v4942_v31 }
 0x646   :  { %4621 = vrcp.f32 %v1302_v8  ;;  %v1729_v8 = vld [vmem:[#allocation5 + $0x48] sm:$0xff] }
 0x64f   :  { %v4620_v46 = vpop.eup %4619 }
 0x650   :  { %v4622_v49 = vpop.eup %4621  ;;  %v1309_v50 = vmul.f32 %v4620_v46, %v1307_v45  ;;  %v1731_v45 = vld [vmem:[#allocation5 + $0x58] sm:$0xff]  ;;  %v5085_v46 = vpack.c.bf16 %v1729_v8, %v1726_v39 }
 0x651   :  { %v1316_v43 = vmul.f32 %v4622_v49, %v1314_v48  ;;  %v1312_v51 = vsub.f32 1.0, %v4622_v49  ;;  %v5087_v48 = vpack.c.bf16 %v1731_v45, %v1728_v44  ;;  %v4773_v49 = vmov 0  }
 0x652   :  { %v1310_v47 = vadd.f32 %v1309_v50, %v4947_v38  ;;  %4563 = vset.pattern.permute.xlu0 %v4773_v49 }
 0x653   :  { %1677 = vperm.xlu0 %4563, %v4900_v19  }
 0x654   :  { %4623 = vtanh.f32 %v1310_v47 }
 0x65e   :  { %v4624_v52 = vpop.eup %4623 }
 0x65f   :  { %v1313_v53 = vmul.f32 %v4624_v52, %v1312_v51 }
 0x661   :  { %v1317_v54 = vadd.f32 %v1316_v43, %v1313_v53 }
 0x663   :  { %v1319_v55 = vrot.slane %v1317_v54, 2  ;;  %v1492_v6 = vrot.slane %v1317_v54, 6 }
 0x665   :  { %3836 = vmatmul.mubr.msk.f32.vlgmr.msra.gmra.mrb[16].mxu0 %vm272_vm3, %v1319_v55  ;;  %4084 = vmatmul.mubr.msk.f32.vlgmr.msra.gmra.mrb[14].mxu1 %vm272_vm3, %v1319_v55 }
 0x666   :  { %4363 = vmatpush1.bf16.msra.mxu0 %v4881_v9  ;;  %4370 = vmatpush3.bf16.msra.mxu1 %v4893_v18 }
 0x667   :  { %4365 = vmatprep.subr.bf16.mxu0 %v4884_v12  ;;  %4371 = vmatprep.subr.bf16.mxu1 %v4771_v23 }
 0x668   :  { %1564 = vmatprep.mubr.f32.mxu0 %v4770_v0  ;;  %4094 = vmatprep.mubr.msk.f32.mxu1 %vm4772_vm2, %v4770_v0 }
 0x66a   :  { %4367 = vmatpush1.bf16.msra.mxu0 %v4902_v20  ;;  %4373 = vmatpush3.bf16.msra.mxu1 %v4912_v24 }
 0x66b   :  { %4382 = vmatprep.subr.bf16.mxu1 %v4771_v23  ;;  %4375 = vmatprep.subr.bf16.mxu0 %v5074_v28 }
 0x6d2   :  { %v1678_v26 = vpop.permute.xlu0 %1677 }
 0x738   :  { %v1388_v60 = vpop.f32.mrb[16].mxu0  ;;  %v1459_v57 = vpop.f32.mrb[14].mxu1 }
 0x739   :  { %v1464_v9 = vrot.slane %v1388_v60, 4  ;;  %v1390_v58 = vpop.f32.mrb[17].mxu0  ;;  %v4085_v18 = vpop.f32.mrb[15].mxu1  ;;  %v1483_v3 = vadd.f32 %v1459_v57, %v4962_v56 }
 0x73a   :  { %v1474_v59 = vrot.slane %v1390_v58, 4 }
 0x73b   :  { %v1466_v12 = vadd.f32 %v1464_v9, %v4949_v40  ;;  %v1485_v4 = vrot.slane %v1483_v3, 4 }
 0x73c   :  { %v1476_v61 = vadd.f32 %v1474_v59, %v4951_v42 }
 0x73d   :  { %v3838_v62 = vmul.f32 -1.442695, %v1466_v12 }
 0x73e   :  { %v3839_v63 = vmul.f32 -1.442695, %v1476_v61 }
 0x73f   :  { %4625 = vpow2.f32 %v3838_v62 }
 0x740   :  { %4627 = vpow2.f32 %v3839_v63 }
 0x749   :  { %v4626_v1 = vpop.eup %4625 }
 0x74a   :  { %v4628_v20 = vpop.eup %4627  ;;  %v1470_v2 = vadd.f32 1.0, %v4626_v1 }
 0x74b   :  { %v1480_v24 = vadd.f32 1.0, %v4628_v20 }
 0x74c   :  { %4629 = vrcp.f32 %v1470_v2 }
 0x74d   :  { %4631 = vrcp.f32 %v1480_v24 }
 0x756   :  { %v4630_v5 = vpop.eup %4629 }
 0x757   :  { %v4632_v7 = vpop.eup %4631  ;;  %v1487_v10 = vmul.f32 %v4630_v5, %v1485_v4  ;;  %v1911_v5 = vld [vmem:[%s5384_s5 + $0x10] sm:$0xff] }
 0x758   :  { %v1494_v11 = vmul.f32 %v4632_v7, %v1492_v6  ;;  %v1490_v14 = vsub.f32 1.0, %v4632_v7  ;;  %v1912_v7 = vld [vmem:[%s5384_s5 + $0x18] sm:$0xff] }
 0x759   :  { %v1488_v13 = vadd.f32 %v1487_v10, %v4947_v38  ;;  %v5122_v10 = vpack.c.bf16 %v1912_v7, %v1911_v5 }
 0x75b   :  { %4633 = vtanh.f32 %v1488_v13  ;;  %v1995_v13 = vld [vmem:[#allocation7 + $0x20] sm:$0xff] }
 0x765   :  { %v4634_v15 = vpop.eup %4633 }
 0x766   :  { %v1491_v16 = vmul.f32 %v4634_v15, %v1490_v14  ;;  %v1991_v15 = vld [vmem:[#allocation7] sm:$0xff] }
 0x768   :  { %v1495_v17 = vadd.f32 %v1494_v11, %v1491_v16  ;;  %v1992_v11 = vld [vmem:[#allocation7 + $0x8] sm:$0xff]  ;;  %v1994_v16 = vld [vmem:[#allocation7 + $0x18] sm:$0xff] }
 0x769   :  { %v5127_v14 = vpack.c.bf16 %v1995_v13, %v1992_v11  ;;  %v1998_v13 = vld [vmem:[#allocation7 + $0x38] sm:$0xff] }
 0x76a   :  { %v1497_v21 = vrot.slane %v1495_v17, 4  ;;  %v1670_v62 = vrot.slane %v1495_v17, 6  ;;  %v5129_v17 = vpack.c.bf16 %v1994_v16, %v1991_v15  ;;  %v2001_v15 = vld [vmem:[#allocation7 + $0x50] sm:$0xff] }
 0x76b   :  { %v5162_v16 = vpack.c.bf16 %v2001_v15, %v1998_v13 }
 0x76c   :  { %3840 = vmatmul.mubr.msk.f32.vlgmr.msra.gmra.mrb[18].mxu0 %vm272_vm3, %v1497_v21  ;;  %4095 = vmatmul.mubr.msk.f32.vlgmr.msra.gmra.mrb[16].mxu1 %vm272_vm3, %v1497_v21  ;;  %v3844_v21 = vld [vmem:[%s5386_s7 + $0x4] ss:$8 sm:$0x7] }
 0x76d   :  { %1800 = vmatprep.mubr.f32.mxu0 %v4770_v0  ;;  %4105 = vmatprep.mubr.msk.f32.mxu1 %vm4772_vm2, %v4770_v0  ;;  %v1684_v22 = vrot.slane %v3844_v21, %v4940_v29  ;;  %v1688_v30 = vrot.slane %v3844_v21, %v4942_v31 }
 0x76e   :  { %4377 = vmatpush1.bf16.msra.mxu0 %v5076_v34  ;;  %4384 = vmatpush3.bf16.msra.mxu1 %v5078_v35 }
 0x76f   :  { %4379 = vmatprep.subr.bf16.mxu0 %v5081_v41  ;;  %4385 = vmatprep.subr.bf16.mxu1 %v4771_v23  ;;  %v1696_v33 = vmul.f32 %v1684_v22, %v1678_v26  ;;  %v1697_v37 = vmul.f32 %v1688_v30, %v1678_v26  ;;  %v1997_v22 = vld [vmem:[#allocation7 + $0x30] sm:$0xff] }
 0x771   :  { %v1717_v39 = vadd.f32 %v1705_v32, %v1696_v33  ;;  %v5176_v32 = vld [vmem:[%s5386_s7 + $0x6] ss:$0 sm:$0xff] }
 0x772   :  { %4381 = vmatpush1.bf16.msra.mxu0 %v5085_v46  ;;  %4387 = vmatpush3.bf16.msra.mxu1 %v5087_v48 }
 0x773   :  { %4388 = vmatprep.subr.bf16.mxu0 %v4771_v23  ;;  %4395 = vmatprep.subr.bf16.mxu1 %v5127_v14 }
 0x83f   :  { %v1566_v50 = vpop.f32.mrb[18].mxu0  ;;  %v1637_v43 = vpop.f32.mrb[16].mxu1 }
 0x840   :  { %v1642_v47 = vrot.slane %v1566_v50, 2  ;;  %v1568_v51 = vpop.f32.mrb[19].mxu0  ;;  %v4096_v52 = vpop.f32.mrb[17].mxu1  ;;  %v1661_v19 = vadd.f32 %v1637_v43, %v4962_v56  ;;  %v1910_v56 = vld [vmem:[%s5384_s5 + $0x8] sm:$0xff]  ;;  %v1718_v43 = vadd.f32 %v1709_v36, %v1697_v37 }
 0x841   :  { %v1652_v53 = vrot.slane %v1568_v51, 2 }
 0x842   :  { %v1644_v54 = vadd.f32 %v1642_v47, %v4949_v40  ;;  %v1663_v12 = vrot.slane %v1661_v19, 2 }
 0x843   :  { %v1654_v55 = vadd.f32 %v1652_v53, %v4951_v42 }
 0x844   :  { %v3842_v60 = vmul.f32 -1.442695, %v1644_v54 }
 0x845   :  { %v3843_v57 = vmul.f32 -1.442695, %v1654_v55 }
 0x846   :  { %4635 = vpow2.f32 %v3842_v60 }
 0x847   :  { %4637 = vpow2.f32 %v3843_v57  ;;  %v5146_v57 = vld [vmem:[%s5386_s7 + $0x3] ss:$0 sm:$0xff] }
 0x850   :  { %v4636_v9 = vpop.eup %4635 }
 0x851   :  { %v4638_v58 = vpop.eup %4637  ;;  %v1648_v18 = vadd.f32 1.0, %v4636_v9  ;;  %v1692_v9 = vrot.slane %v3844_v21, %v4935_v27  ;;  %v2002_v21 = vld [vmem:[#allocation7 + $0x58] sm:$0xff] }
 0x852   :  { %v1658_v59 = vadd.f32 1.0, %v4638_v58 }
 0x853   :  { %4639 = vrcp.f32 %v1648_v18  ;;  %v1698_v19 = vmul.f32 %v1692_v9, %v1678_v26 }
 0x854   :  { %4641 = vrcp.f32 %v1658_v59  ;;  %v1713_v59 = vrot.slane %v3845_v25, %v4935_v27  ;;  %v2000_v25 = vld [vmem:[#allocation7 + $0x48] sm:$0xff] }
 0x855   :  { %v5166_v30 = vpack.c.bf16 %v2000_v25, %v1997_v22 }
 0x85d   :  { %v4640_v61 = vpop.eup %4639 }
 0x85e   :  { %v4642_v63 = vpop.eup %4641  ;;  %v1665_v1 = vmul.f32 %v4640_v61, %v1663_v12 }
 0x85f   :  { %v1672_v40 = vmul.f32 %v4642_v63, %v1670_v62  ;;  %v1668_v20 = vsub.f32 1.0, %v4642_v63  ;;  %v1719_v63 = vadd.f32 %v1713_v59, %v1698_v19 }
 0x860   :  { %v1666_v42 = vadd.f32 %v1665_v1, %v4947_v38  ;;  %v1909_v38 = vld [vmem:[%s5384_s5] sm:$0xff] }
 0x861   :  { %v5116_v6 = vpack.c.bf16 %v1910_v56, %v1909_v38  ;;  %v1993_v38 = vld [vmem:[#allocation7 + $0x10] sm:$0xff]  ;;  %v1996_v56 = vld [vmem:[#allocation7 + $0x28] sm:$0xff] }
 0x862   :  { %4643 = vtanh.f32 %v1666_v42  ;;  %v5152_v7 = vpack.c.bf16 %v1996_v56, %v1993_v38 }
 0x86c   :  { %v4644_v2 = vpop.eup %4643 }
 0x86d   :  { %v1669_v24 = vmul.f32 %v4644_v2, %v1668_v20 }
 0x86f   :  { %v5099_v3 = vadd.f32 %v1672_v40, %v1669_v24 }
 0x871   :  { %v1733_v4 = vrot.slane %v5099_v3, 6 }
 0x873   :  { %3846 = vmatmul.mubr.msk.f32.vlgmr.msra.gmra.mrb[20].mxu0 %vm272_vm3, %v1733_v4  ;;  %4106 = vmatmul.mubr.msk.f32.vlgmr.msra.gmra.mrb[18].mxu1 %vm272_vm3, %v1733_v4 }
 0x874   :  { %4116 = vmatprep.mubr.msk.f32.mxu0 %vm4772_vm2, %v4770_v0  ;;  %2088 = vmatprep.mubr.f32.mxu1 %v4770_v0 }
 0x875   :  { %4390 = vmatpush3.bf16.msra.mxu0 %v5116_v6  ;;  %4397 = vmatpush1.bf16.msra.mxu1 %v5129_v17 }
 0x876   :  { %4391 = vmatprep.subr.bf16.mxu0 %v4771_v23  ;;  %4399 = vmatprep.subr.bf16.mxu1 %v5162_v16 }
 0x879   :  { %4393 = vmatpush3.bf16.msra.mxu0 %v5122_v10  ;;  %4401 = vmatpush1.bf16.msra.mxu1 %v5166_v30 }
 0x87a   :  { %4402 = vmatprep.subr.bf16.mxu0 %v4771_v23  ;;  %4409 = vmatprep.subr.bf16.mxu1 %v5074_v28 }
 0x946   :  { %v1802_v8 = vpop.f32.mrb[20].mxu0  ;;  %v1873_v44 = vpop.f32.mrb[18].mxu1 }
 0x947   :  { %v1879_v45 = vrot.slane %v1802_v8, 2  ;;  %v1804_v49 = vpop.f32.mrb[21].mxu0  ;;  %v4107_v50 = vpop.f32.mrb[19].mxu1  ;;  %v1898_v18 = vadd.f32 %v5146_v57, %v1873_v44 }
 0x948   :  { %v1889_v47 = vrot.slane %v1804_v49, 2 }
 0x949   :  { %v1881_v51 = vadd.f32 %v1879_v45, %v1717_v39  ;;  %v1900_v61 = vrot.slane %v1898_v18, 2  ;;  %v3851_v45 = vld [vmem:[%s5386_s7 + $0x5] ss:$8 sm:$0x7] }
 0x94a   :  { %v1891_v53 = vadd.f32 %v1889_v47, %v1718_v43  ;;  %v2009_v49 = vrot.slane %v3851_v45, %v4940_v29  ;;  %v2013_v47 = vrot.slane %v3851_v45, %v4942_v31  ;;  %v2017_v59 = vrot.slane %v3851_v45, %v4935_v27 }
 0x94b   :  { %v3848_v52 = vmul.f32 -1.442695, %v1881_v51 }
 0x94c   :  { %v3849_v54 = vmul.f32 -1.442695, %v1891_v53 }
 0x94d   :  { %4645 = vpow2.f32 %v3848_v52 }
 0x94e   :  { %4647 = vpow2.f32 %v3849_v54 }
 0x957   :  { %v4646_v55 = vpop.eup %4645 }
 0x958   :  { %v1885_v60 = vadd.f32 1.0, %v4646_v55  ;;  %v4648_v58 = vpop.eup %4647 }
 0x959   :  { %v1895_v12 = vadd.f32 1.0, %v4648_v58 }
 0x95a   :  { %4649 = vrcp.f32 %v1885_v60 }
 0x95b   :  { %4651 = vrcp.f32 %v1895_v12 }
 0x964   :  { %v4650_v62 = vpop.eup %4649 }
 0x965   :  { %v1902_v1 = vmul.f32 %v4650_v62, %v1900_v61  ;;  %v4652_v42 = vpop.eup %4651 }
 0x966   :  { %v1905_v20 = vsub.f32 1.0, %v4652_v42  ;;  %v1907_v4 = vmul.f32 %v4652_v42, %v5099_v3  ;;  %v1999_v3 = vld [vmem:[#allocation7 + $0x40] sm:$0xff] }
 0x967   :  { %v1903_v40 = vadd.f32 %v1902_v1, %v1719_v63  ;;  %v5164_v26 = vpack.c.bf16 %v2002_v21, %v1999_v3  ;;  %v3859_v3 = vld [vmem:[%s5386_s7 + $0x5] ss:$8 sm:$0x7] }
 0x968   :  { %v2439_v21 = vrot.slane %v3859_v3, %v4940_v29 }
 0x969   :  { %4653 = vtanh.f32 %v1903_v40 }
 0x973   :  { %v4654_v2 = vpop.eup %4653 }
 0x974   :  { %v1906_v24 = vmul.f32 %v4654_v2, %v1905_v20 }
 0x976   :  { %v1908_v5 = vadd.f32 %v1907_v4, %v1906_v24 }
 0x978   :  { %v5154_v11 = vrot.slane %v1908_v5, 6 }
 0x97a   :  { %4117 = vmatmul.mubr.msk.f32.vlgmr.msra.gmra.mrb[22].mxu0 %vm272_vm3, %v5154_v11 }
 0x97b   :  { %4404 = vmatpush3.bf16.msra.mxu0 %v5152_v7  ;;  %4127 = vmatprep.mubr.msk.f32.mxu0 %vm4772_vm2, %v4770_v0 }
 0x97c   :  { %4405 = vmatprep.subr.bf16.mxu0 %v4771_v23 }
 0x97f   :  { %4407 = vmatpush3.bf16.msra.mxu0 %v5164_v26 }
 0x980   :  { %4416 = vmatprep.subr.bf16.mxu0 %v4771_v23 }
 0xa4d   :  { %v1984_v33 = vpop.f32.mrb[22].mxu0 }
 0xa4e   :  { %v1985_v36 = vadd.f32 %v1984_v33, %v5176_v32  ;;  %v4118_v37 = vpop.f32.mrb[23].mxu0  ;;  %v2443_v33 = vrot.slane %v3859_v3, %v4942_v31 }
 0xa50   :  { %v1988_v39 = vmax.f32 %v1985_v36, 0.0 }
 0xa52   :  { %1990 = vst.msk [vmem:[#allocation2] sm:$0x3] %vm1989_vm4, %v1988_v39  ;;  %3852 = vmatmul.mubr.msk.f32.vlgmr.msra.gmra.mrb[20].mxu1 %vm272_vm3, %v1988_v39  ;;  %4128 = vmatmul.mubr.msk.f32.vlgmr.msra.gmra.mrb[24].mxu0 %vm272_vm3, %v1988_v39 }
 0xa53   :  { %4418 = vmatpush3.bf16.msra.mxu0 %v5078_v35  ;;  %4411 = vmatpush1.bf16.msra.mxu1 %v5076_v34 }
 0xa54   :  { %4419 = vmatprep.subr.bf16.mxu0 %v4771_v23  ;;  %4413 = vmatprep.subr.bf16.mxu1 %v5081_v41 }
 0xa55   :  { %4138 = vmatprep.mubr.msk.f32.mxu0 %vm4772_vm2, %v4770_v0  ;;  %2241 = vmatprep.mubr.f32.mxu1 %v4770_v0 }
 0xa57   :  { %4421 = vmatpush3.bf16.msra.mxu0 %v5087_v48  ;;  %4415 = vmatpush1.bf16.msra.mxu1 %v5085_v46 }
 0xa58   :  { %4422 = vmatprep.subr.bf16.mxu1 %v4771_v23  ;;  %4429 = vmatprep.subr.bf16.mxu0 %v5127_v14 }
 0xa5a   :  { %4139 = vmatmul.mubr.msk.f32.vlgmr.msra.gmra.mrb[26].mxu0 %vm272_vm3, %v5154_v11  ;;  %3854 = vmatmul.mubr.msk.f32.vlgmr.msra.gmra.mrb[20].mxu1 %vm272_vm3, %v5154_v11 }
 0xa5b   :  { %4424 = vmatpush3.bf16.msra.mxu1 %v5116_v6  ;;  %4149 = vmatprep.mubr.msk.f32.mxu1 %vm4772_vm2, %v4770_v0 }
 0xa5c   :  { %4425 = vmatprep.subr.bf16.mxu1 %v4771_v23  ;;  %4431 = vmatpush1.bf16.msra.mxu0 %v5129_v17 }
 0xa5d   :  { %4433 = vmatprep.subr.bf16.mxu0 %v5162_v16  ;;  %2518 = vmatprep.mubr.f32.mxu0 %v4770_v0 }
 0xa5f   :  { %4427 = vmatpush3.bf16.msra.mxu1 %v5122_v10 }
 0xa60   :  { %4436 = vmatprep.subr.bf16.mxu1 %v4771_v23  ;;  %4435 = vmatpush1.bf16.msra.mxu0 %v5166_v30 }
 0xa61   :  { %4443 = vmatprep.subr.bf16.mxu0 %v5074_v28 }
 0xb25   :  { %v2161_v8 = vpop.f32.mrb[24].mxu0 }
 0xb26   :  { %v4129_v44 = vpop.f32.mrb[25].mxu0  ;;  %v2162_v62 = vadd.f32 %v2161_v8, %v2017_v59 }
 0xb2d   :  { %v2314_v50 = vpop.f32.mrb[26].mxu0  ;;  %v2243_v43 = vpop.f32.mrb[20].mxu1 }
 0xb2e   :  { %v4538_v51 = vadd.f32 %v2243_v43, %v2009_v49  ;;  %v4140_v52 = vpop.f32.mrb[27].mxu0  ;;  %v2245_v53 = vpop.f32.mrb[21].mxu1  ;;  %v2333_v12 = vadd.f32 %v2314_v50, %v5146_v57 }
 0xb2f   :  { %v4539_v55 = vadd.f32 %v2245_v53, %v2013_v47  ;;  %v2447_v47 = vrot.slane %v3859_v3, %v4935_v27 }
 0xb30   :  { %v3856_v54 = vmul.f32 -1.442695, %v4538_v51 }
 0xb31   :  { %v3857_v60 = vmul.f32 -1.442695, %v4539_v55 }
 0xb32   :  { %4655 = vpow2.f32 %v3856_v54 }
 0xb33   :  { %4657 = vpow2.f32 %v3857_v60 }
 0xb3c   :  { %v4656_v9 = vpop.eup %4655 }
 0xb3d   :  { %v2323_v58 = vadd.f32 1.0, %v4656_v9  ;;  %v4658_v18 = vpop.eup %4657 }
 0xb3e   :  { %v2330_v19 = vadd.f32 1.0, %v4658_v18 }
 0xb3f   :  { %4659 = vrcp.f32 %v2323_v58 }
 0xb40   :  { %4661 = vrcp.f32 %v2330_v19 }
 0xb49   :  { %v4660_v61 = vpop.eup %4659 }
 0xb4a   :  { %v2334_v63 = vmul.f32 %v4660_v61, %v2333_v12  ;;  %v4662_v40 = vpop.eup %4661 }
 0xb4b   :  { %v2337_v42 = vsub.f32 1.0, %v4662_v40  ;;  %v2340_v24 = vmul.f32 %v4662_v40, %v5154_v11 }
 0xb4c   :  { %v2335_v1 = vadd.f32 %v2334_v63, %v2162_v62 }
 0xb4e   :  { %4663 = vtanh.f32 %v2335_v1 }
 0xb58   :  { %v4664_v20 = vpop.eup %4663 }
 0xb59   :  { %v2338_v2 = vmul.f32 %v4664_v20, %v2337_v42  ;;  %v3867_v42 = vld [vmem:[%s5386_s7 + $0x5] ss:$8 sm:$0x7] }
 0xb5b   :  { %v5216_v4 = vadd.f32 %v2340_v24, %v2338_v2  ;;  %v2872_v2 = vrot.slane %v3867_v42, %v4942_v31 }
 0xb5d   :  { %4150 = vmatmul.mubr.msk.f32.vlgmr.msra.gmra.mrb[22].mxu1 %vm272_vm3, %v5216_v4 }
 0xb5e   :  { %4438 = vmatpush3.bf16.msra.mxu1 %v5152_v7  ;;  %4160 = vmatprep.mubr.msk.f32.mxu1 %vm4772_vm2, %v4770_v0 }
 0xb5f   :  { %4439 = vmatprep.subr.bf16.mxu1 %v4771_v23 }
 0xb62   :  { %4441 = vmatpush3.bf16.msra.mxu1 %v5164_v26 }
 0xb63   :  { %4450 = vmatprep.subr.bf16.mxu1 %v4771_v23 }
 0xc30   :  { %v2416_v38 = vpop.f32.mrb[22].mxu1 }
 0xc31   :  { %v2417_v56 = vadd.f32 %v2416_v38, %v5176_v32  ;;  %v4151_v5 = vpop.f32.mrb[23].mxu1 }
 0xc33   :  { %v2420_v11 = vmax.f32 %v2417_v56, 0.0 }
 0xc35   :  { %2421 = vst.msk [vmem:[#allocation2 + $0x2] sm:$0x3] %vm1989_vm4, %v2420_v11  ;;  %3860 = vmatmul.mubr.msk.f32.vlgmr.msra.gmra.mrb[28].mxu0 %vm272_vm3, %v2420_v11  ;;  %4161 = vmatmul.mubr.msk.f32.vlgmr.msra.gmra.mrb[24].mxu1 %vm272_vm3, %v2420_v11 }
 0xc36   :  { %4452 = vmatpush3.bf16.msra.mxu1 %v5078_v35  ;;  %4445 = vmatpush1.bf16.msra.mxu0 %v5076_v34 }
 0xc37   :  { %4453 = vmatprep.subr.bf16.mxu1 %v4771_v23  ;;  %4447 = vmatprep.subr.bf16.mxu0 %v5081_v41 }
 0xc38   :  { %4171 = vmatprep.mubr.msk.f32.mxu1 %vm4772_vm2, %v4770_v0  ;;  %2671 = vmatprep.mubr.f32.mxu0 %v4770_v0 }
 0xc3a   :  { %4455 = vmatpush3.bf16.msra.mxu1 %v5087_v48  ;;  %4449 = vmatpush1.bf16.msra.mxu0 %v5085_v46 }
 0xc3b   :  { %4456 = vmatprep.subr.bf16.mxu0 %v4771_v23  ;;  %4463 = vmatprep.subr.bf16.mxu1 %v5127_v14 }
 0xc3d   :  { %4172 = vmatmul.mubr.msk.f32.vlgmr.msra.gmra.mrb[26].mxu1 %vm272_vm3, %v5216_v4  ;;  %3862 = vmatmul.mubr.msk.f32.vlgmr.msra.gmra.mrb[28].mxu0 %vm272_vm3, %v5216_v4 }
 0xc3e   :  { %4458 = vmatpush3.bf16.msra.mxu0 %v5116_v6  ;;  %4182 = vmatprep.mubr.msk.f32.mxu0 %vm4772_vm2, %v4770_v0 }
 0xc3f   :  { %4459 = vmatprep.subr.bf16.mxu0 %v4771_v23  ;;  %4465 = vmatpush1.bf16.msra.mxu1 %v5129_v17 }
 0xc40   :  { %4467 = vmatprep.subr.bf16.mxu1 %v5162_v16  ;;  %2947 = vmatprep.mubr.f32.mxu1 %v4770_v0 }
 0xc42   :  { %4461 = vmatpush3.bf16.msra.mxu0 %v5122_v10 }
 0xc43   :  { %4470 = vmatprep.subr.bf16.mxu0 %v4771_v23  ;;  %4469 = vmatpush1.bf16.msra.mxu1 %v5166_v30 }
 0xc44   :  { %4477 = vmatprep.subr.bf16.mxu1 %v5074_v28 }
 0xd08   :  { %v2591_v13 = vpop.f32.mrb[24].mxu1 }
 0xd09   :  { %v4162_v15 = vpop.f32.mrb[25].mxu1  ;;  %v2592_v54 = vadd.f32 %v2591_v13, %v2447_v47 }
 0xd0a   :  { %v2876_v15 = vrot.slane %v3867_v42, %v4935_v27 }
 0xd10   :  { %v2744_v22 = vpop.f32.mrb[26].mxu1  ;;  %v2673_v25 = vpop.f32.mrb[28].mxu0 }
 0xd11   :  { %v4540_v36 = vadd.f32 %v2673_v25, %v2439_v21  ;;  %v4173_v37 = vpop.f32.mrb[27].mxu1  ;;  %v2675_v39 = vpop.f32.mrb[29].mxu0  ;;  %v2763_v52 = vadd.f32 %v2744_v22, %v5146_v57 }
 0xd12   :  { %v4541_v44 = vadd.f32 %v2675_v39, %v2443_v33 }
 0xd13   :  { %v3864_v8 = vmul.f32 -1.442695, %v4540_v36 }
 0xd14   :  { %v3865_v45 = vmul.f32 -1.442695, %v4541_v44 }
 0xd15   :  { %4665 = vpow2.f32 %v3864_v8 }
 0xd16   :  { %4667 = vpow2.f32 %v3865_v45 }
 0xd1f   :  { %v4666_v49 = vpop.eup %4665 }
 0xd20   :  { %v2753_v50 = vadd.f32 1.0, %v4666_v49  ;;  %v4668_v43 = vpop.eup %4667 }
 0xd21   :  { %v2760_v51 = vadd.f32 1.0, %v4668_v43 }
 0xd22   :  { %4669 = vrcp.f32 %v2753_v50 }
 0xd23   :  { %4671 = vrcp.f32 %v2760_v51 }
 0xd2c   :  { %v4670_v53 = vpop.eup %4669 }
 0xd2d   :  { %v2764_v55 = vmul.f32 %v4670_v53, %v2763_v52  ;;  %v4672_v9 = vpop.eup %4671 }
 0xd2e   :  { %v2767_v58 = vsub.f32 1.0, %v4672_v9  ;;  %v2769_v19 = vmul.f32 %v4672_v9, %v5216_v4 }
 0xd2f   :  { %v2765_v60 = vadd.f32 %v2764_v55, %v2592_v54 }
 0xd31   :  { %4673 = vtanh.f32 %v2765_v60 }
 0xd3b   :  { %v4674_v18 = vpop.eup %4673 }
 0xd3c   :  { %v2768_v59 = vmul.f32 %v4674_v18, %v2767_v58 }
 0xd3e   :  { %v5264_v12 = vadd.f32 %v2769_v19, %v2768_v59 }
 0xd40   :  { %4183 = vmatmul.mubr.msk.f32.vlgmr.msra.gmra.mrb[30].mxu0 %vm272_vm3, %v5264_v12 }
 0xd41   :  { %4472 = vmatpush3.bf16.msra.mxu0 %v5152_v7  ;;  %4193 = vmatprep.mubr.msk.f32.mxu0 %vm4772_vm2, %v4770_v0 }
 0xd42   :  { %4473 = vmatprep.subr.bf16.mxu0 %v4771_v23 }
 0xd45   :  { %4475 = vmatpush3.bf16.msra.mxu0 %v5164_v26 }
 0xd46   :  { %4484 = vmatprep.subr.bf16.mxu0 %v4771_v23 }
 0xe13   :  { %v2845_v61 = vpop.f32.mrb[30].mxu0 }
 0xe14   :  { %v2846_v62 = vadd.f32 %v2845_v61, %v5176_v32  ;;  %v4184_v63 = vpop.f32.mrb[31].mxu0 }
 0xe16   :  { %v2849_v1 = vmax.f32 %v2846_v62, 0.0 }
 0xe18   :  { %2850 = vst.msk [vmem:[#allocation2 + $0x4] sm:$0x3] %vm1989_vm4, %v2849_v1  ;;  %3868 = vmatmul.mubr.msk.f32.vlgmr.msra.gmra.mrb[28].mxu1 %vm272_vm3, %v2849_v1  ;;  %4194 = vmatmul.mubr.msk.f32.vlgmr.msra.gmra.mrb[32].mxu0 %vm272_vm3, %v2849_v1 }
 0xe19   :  { %4486 = vmatpush3.bf16.msra.mxu0 %v5078_v35  ;;  %4479 = vmatpush1.bf16.msra.mxu1 %v5076_v34 }
 0xe1a   :  { %4487 = vmatprep.subr.bf16.mxu0 %v4771_v23  ;;  %4481 = vmatprep.subr.bf16.mxu1 %v5081_v41 }
 0xe1b   :  { %4204 = vmatprep.mubr.msk.f32.mxu0 %vm4772_vm2, %v4770_v0  ;;  %3100 = vmatprep.mubr.f32.mxu1 %v4770_v0 }
 0xe1d   :  { %4489 = vmatpush3.bf16.msra.mxu0 %v5087_v48  ;;  %4483 = vmatpush1.bf16.msra.mxu1 %v5085_v46 }
 0xe1e   :  { %4490 = vmatprep.subr.bf16.mxu1 %v4771_v23  ;;  %4497 = vmatprep.subr.bf16.mxu0 %v5127_v14 }
 0xe20   :  { %4205 = vmatmul.mubr.msk.f32.vlgmr.msra.gmra.mrb[34].mxu0 %vm272_vm3, %v5264_v12  ;;  %3870 = vmatmul.mubr.msk.f32.vlgmr.msra.gmra.mrb[28].mxu1 %vm272_vm3, %v5264_v12 }
 0xe21   :  { %4492 = vmatpush3.bf16.msra.mxu1 %v5116_v6  ;;  %4215 = vmatprep.mubr.msk.f32.mxu1 %vm4772_vm2, %v4770_v0 }
 0xe22   :  { %4493 = vmatprep.subr.bf16.mxu1 %v4771_v23  ;;  %4499 = vmatpush1.bf16.msra.mxu0 %v5129_v17  ;;  %v2868_v17 = vrot.slane %v3867_v42, %v4940_v29 }
 0xe23   :  { %4501 = vmatprep.subr.bf16.mxu0 %v5162_v16  ;;  %3376 = vmatprep.mubr.f32.mxu0 %v4770_v0 }
 0xe25   :  { %4495 = vmatpush3.bf16.msra.mxu1 %v5122_v10 }
 0xe26   :  { %4504 = vmatprep.subr.bf16.mxu1 %v4771_v23  ;;  %4503 = vmatpush1.bf16.msra.mxu0 %v5166_v30 }
 0xe27   :  { %4511 = vmatprep.subr.bf16.mxu0 %v5074_v28 }
 0xeeb   :  { %v3020_v14 = vpop.f32.mrb[32].mxu0 }
 0xeec   :  { %v4195_v40 = vpop.f32.mrb[33].mxu0  ;;  %v3021_v25 = vadd.f32 %v3020_v14, %v2876_v15 }
 0xef3   :  { %v3173_v20 = vpop.f32.mrb[34].mxu0  ;;  %v3102_v16 = vpop.f32.mrb[28].mxu1 }
 0xef4   :  { %v4542_v24 = vadd.f32 %v3102_v16, %v2868_v17  ;;  %v4206_v4 = vpop.f32.mrb[35].mxu0  ;;  %v3104_v38 = vpop.f32.mrb[29].mxu1  ;;  %v3192_v21 = vadd.f32 %v3173_v20, %v5146_v57  ;;  %v3713_v17 = vld [vmem:[%s5385_s6 + $0x10] sm:$0xff]  ;;  %v3714_v20 = vld [vmem:[%s5385_s6 + $0x18] sm:$0xff] }
 0xef5   :  { %v4543_v5 = vadd.f32 %v3104_v38, %v2872_v2  ;;  %v4534_v16 = vpack.c.bf16 %v3714_v20, %v3713_v17 }
 0xef6   :  { %v3872_v56 = vmul.f32 -1.442695, %v4542_v24 }
 0xef7   :  { %v3873_v30 = vmul.f32 -1.442695, %v4543_v5  ;;  %v3715_v5 = vld [vmem:[%s5386_s7 + $0x7] ss:$0 sm:$0xff] }
 0xef8   :  { %4675 = vpow2.f32 %v3872_v56 }
 0xef9   :  { %4677 = vpow2.f32 %v3873_v30 }
 0xf02   :  { %v4676_v28 = vpop.eup %4675 }
 0xf03   :  { %v3182_v11 = vadd.f32 1.0, %v4676_v28  ;;  %v4678_v13 = vpop.eup %4677 }
 0xf04   :  { %v3189_v3 = vadd.f32 1.0, %v4678_v13 }
 0xf05   :  { %4679 = vrcp.f32 %v3182_v11 }
 0xf06   :  { %4681 = vrcp.f32 %v3189_v3 }
 0xf0f   :  { %v4680_v22 = vpop.eup %4679 }
 0xf10   :  { %v3193_v33 = vmul.f32 %v4680_v22, %v3192_v21  ;;  %v4682_v37 = vpop.eup %4681 }
 0xf11   :  { %v3196_v39 = vsub.f32 1.0, %v4682_v37  ;;  %v3198_v45 = vmul.f32 %v4682_v37, %v5264_v12 }
 0xf12   :  { %v3194_v36 = vadd.f32 %v3193_v33, %v3021_v25 }
 0xf14   :  { %4683 = vtanh.f32 %v3194_v36 }
 0xf1e   :  { %v4684_v8 = vpop.eup %4683 }
 0xf1f   :  { %v3197_v44 = vmul.f32 %v4684_v8, %v3196_v39 }
 0xf21   :  { %v5312_v49 = vadd.f32 %v3198_v45, %v3197_v44 }
 0xf23   :  { %4216 = vmatmul.mubr.msk.f32.vlgmr.msra.gmra.mrb[30].mxu1 %vm272_vm3, %v5312_v49 }
 0xf24   :  { %4506 = vmatpush3.bf16.msra.mxu1 %v5152_v7  ;;  %4226 = vmatprep.mubr.msk.f32.mxu1 %vm4772_vm2, %v4770_v0 }
 0xf25   :  { %4507 = vmatprep.subr.bf16.mxu1 %v4771_v23 }
 0xf28   :  { %4509 = vmatpush3.bf16.msra.mxu1 %v5164_v26 }
 0xf29   :  { %4518 = vmatprep.subr.bf16.mxu1 %v4771_v23 }
 0xff6   :  { %v3274_v50 = vpop.f32.mrb[30].mxu1 }
 0xff7   :  { %v3275_v43 = vadd.f32 %v3274_v50, %v5176_v32  ;;  %v4217_v47 = vpop.f32.mrb[31].mxu1 }
 0xff9   :  { %v3278_v51 = vmax.f32 %v3275_v43, 0.0 }
 0xffb   :  { %3279 = vst.msk [vmem:[#allocation2 + $0x6] sm:$0x3] %vm1989_vm4, %v3278_v51  ;;  %3876 = vmatmul.mubr.msk.f32.vlgmr.msra.gmra.mrb[36].mxu0 %vm272_vm3, %v3278_v51  ;;  %4227 = vmatmul.mubr.msk.f32.vlgmr.msra.gmra.mrb[32].mxu1 %vm272_vm3, %v3278_v51 }
 0xffc   :  { %4520 = vmatpush3.bf16.msra.mxu1 %v5078_v35  ;;  %4513 = vmatpush1.bf16.msra.mxu0 %v5076_v34 }
 0xffd   :  { %4521 = vmatprep.subr.bf16.mxu1 %v4771_v23  ;;  %4515 = vmatprep.subr.bf16.mxu0 %v5081_v41  ;;  %v3875_v41 = vld [vmem:[%s5386_s7 + $0x5] ss:$8 sm:$0x7] }
 0xffe   :  { %4237 = vmatprep.mubr.msk.f32.mxu1 %vm4772_vm2, %v4770_v0  ;;  %3529 = vmatprep.mubr.f32.mxu0 %v4770_v0  ;;  %v3301_v52 = vrot.slane %v3875_v41, %v4942_v31  ;;  %v3305_v58 = vrot.slane %v3875_v41, %v4935_v27  ;;  %v3711_v27 = vld [vmem:[%s5385_s6] sm:$0xff] }
0x1000   :  { %4523 = vmatpush3.bf16.msra.mxu1 %v5087_v48  ;;  %4517 = vmatpush1.bf16.msra.mxu0 %v5085_v46  ;;  %v3297_v46 = vrot.slane %v3875_v41, %v4940_v29 }
0x1001   :  { %4524 = vmatprep.subr.bf16.mxu0 %v4771_v23 }
0x1002   :  { %v3709_v7 = vld [vmem:[#allocation2] sm:$0xff] }
0x1003   :  { %4238 = vmatmul.mubr.msk.f32.vlgmr.msra.gmra.mrb[34].mxu1 %vm272_vm3, %v5312_v49  ;;  %3878 = vmatmul.mubr.msk.f32.vlgmr.msra.gmra.mrb[36].mxu0 %vm272_vm3, %v5312_v49 }
0x1004   :  { %4259 = vmatprep.mubr.msk.f32.mxu1 %vm272_vm3, %v3709_v7  ;;  %4526 = vmatpush3.bf16.msra.mxu0 %v5116_v6 }
0x1005   :  { %4527 = vmatprep.subr.bf16.mxu0 %v4771_v23  ;;  %4248 = vmatprep.mubr.msk.f32.mxu0 %vm4772_vm2, %v4770_v0 }
0x1008   :  { %4529 = vmatpush3.bf16.msra.mxu0 %v5122_v10 }
0x10ce   :  { %v3449_v34 = vpop.f32.mrb[32].mxu1 }
0x10cf   :  { %v4228_v35 = vpop.f32.mrb[33].mxu1  ;;  %v3450_v19 = vadd.f32 %v3449_v34, %v3305_v58 }
0x10d6   :  { %v3602_v48 = vpop.f32.mrb[34].mxu1  ;;  %v3531_v26 = vpop.f32.mrb[36].mxu0 }
0x10d7   :  { %v4544_v6 = vadd.f32 %v3531_v26, %v3297_v46  ;;  %v4239_v53 = vpop.f32.mrb[35].mxu1  ;;  %v3533_v23 = vpop.f32.mrb[37].mxu0  ;;  %v3621_v29 = vadd.f32 %v3602_v48, %v5146_v57  ;;  %v3712_v57 = vld [vmem:[%s5385_s6 + $0x8] sm:$0xff] }
0x10d8   :  { %v4545_v55 = vadd.f32 %v3533_v23, %v3301_v52  ;;  %v4530_v42 = vpack.c.bf16 %v3712_v57, %v3711_v27 }
0x10d9   :  { %v3880_v54 = vmul.f32 -1.442695, %v4544_v6 }
0x10da   :  { %v3881_v0 = vmul.f32 -1.442695, %v4545_v55  ;;  %4531 = vmatprep.subr.bf16.mxu1 %v4530_v42 }
0x10db   :  { %4685 = vpow2.f32 %v3880_v54  ;;  %4533 = vmatpush3.bf16.msra.mxu1 %v4530_v42 }
0x10dc   :  { %4687 = vpow2.f32 %v3881_v0  ;;  %4535 = vmatprep.subr.bf16.mxu1 %v4534_v16 }
0x10df   :  { %4537 = vmatpush3.bf16.msra.mxu1 %v4534_v16 }
0x10e5   :  { %v4686_v10 = vpop.eup %4685 }
0x10e6   :  { %v3611_v60 = vadd.f32 1.0, %v4686_v10  ;;  %v4688_v9 = vpop.eup %4687 }
0x10e7   :  { %v3618_v18 = vadd.f32 1.0, %v4688_v9 }
0x10e8   :  { %4689 = vrcp.f32 %v3611_v60 }
0x10e9   :  { %4691 = vrcp.f32 %v3618_v18 }
0x10f2   :  { %v4690_v59 = vpop.eup %4689 }
0x10f3   :  { %v3622_v31 = vmul.f32 %v4690_v59, %v3621_v29  ;;  %v4692_v61 = vpop.eup %4691 }
0x10f4   :  { %v3625_v62 = vsub.f32 1.0, %v4692_v61  ;;  %v3627_v14 = vmul.f32 %v4692_v61, %v5312_v49 }
0x10f5   :  { %v3623_v12 = vadd.f32 %v3622_v31, %v3450_v19 }
0x10f7   :  { %4693 = vtanh.f32 %v3623_v12 }
0x1101   :  { %v4694_v63 = vpop.eup %4693 }
0x1102   :  { %v3626_v1 = vmul.f32 %v4694_v63, %v3625_v62 }
0x1104   :  { %v3628_v40 = vadd.f32 %v3627_v14, %v3626_v1 }
0x1106   :  { %4249 = vmatmul.mubr.msk.f32.vlgmr.msra.gmra.mrb[38].mxu0 %vm272_vm3, %v3628_v40 }
0x11d9   :  { %v3703_v2 = vpop.f32.mrb[38].mxu0 }
0x11da   :  { %v3704_v24 = vadd.f32 %v3703_v2, %v5176_v32  ;;  %v4250_v4 = vpop.f32.mrb[39].mxu0 }
0x11dc   :  { %v3707_v38 = vmax.f32 %v3704_v24, 0.0 }
0x11de   :  { %3708 = vst.msk [vmem:[#allocation2 + $0x8] sm:$0x3] %vm1989_vm4, %v3707_v38 }
0x11e5   :  { %v3710_v56 = vld [vmem:[#allocation2 + $0x8] sm:$0x3] }
0x11e6   :  { %4260 = vmatmul.mubr.msk.f32.vlgmr.msra.gmra.mrb[36].mxu1 %vm272_vm3, %v3710_v56 }
0x12b9   :  { %v4261_v30 = vpop.f32.mrb[36].mxu1 }
0x12ba   :  { %v3794_v28 = vadd.f32 %v4261_v30, %v3715_v5  ;;  %v3788_v11 = vpop.f32.mrb[37].mxu1 }
0x12bb   :  { %v3789_v13 = vadd.f32 %v3788_v11, %v3715_v5 }
0x12bc   :  { %3800 = vst.msk [vmem:[%s5387_s8 + $0x8] sm:$0x3] %vm3799_vm5, %v3794_v28 }
0x12bd   :  { %3798 = vst.msk [vmem:[%s5387_s8] sm:$0xff] %vm3797_vm6, %v3789_v13 }
0x12be   :  { %3805 = vsyncpa [#allocation4], 1 }
0x12bf   :  { %3806 = vsyncpa [#allocation6], 1 }

</bundles_post_ra>
